<compile_context>
chip_gen: v7x
topology: tpu7x:2x2x1
jax: 0.10.0
libtpu: 0.0.40
codegen_flags: <defaults>
</compile_context>

<pallas_src>
import functools

import jax
import jax.numpy as jnp
from jax.experimental import pallas as pl
from jax.experimental.pallas import tpu as pltpu

# ----------------------------- configuration --------------------------------
TIME_WINDOW = 25          # must be in {20, 25, 50}; conv arithmetic needs H=128
HIDDEN = 128
N_GNN_LAYERS = 6
EQ_VARIABLES = {}         # empty dict -> n_variables = 1 (only pos_t)
N_VARIABLES = len(EQ_VARIABLES) + 1
PDE_L = 16.0
PDE_TMAX = 4.0
PDE_DT = PDE_TMAX / TIME_WINDOW

CONV_HIDDEN = 304         # 38 conv positions * 8 channels (time_window == 25)
CONV_HIDDEN_PAD = 384     # next multiple of 128 -> lane-dense intermediate
OUT_PAD = 128             # output columns padded 25 -> 128 -> unmasked stores

ROW_TILE_TARGET = 512     # sweep 512-1024; >=512 reaches ~85% of HBM roofline


def _round_up(x, m):
    return ((x + m - 1) // m) * m


def _row_tile(rows, target=ROW_TILE_TARGET):
    """(8, *)-aligned row tile.  Capped at ceil(rows/2) so the row grid has at
    least two steps whenever the problem allows it (v7x: 2 TensorCores under
    dimension_semantics=("parallel",)).  Same policy on every chip: the MXU
    shape does not constrain the M dimension, so the v5e=128 case is gone."""
    half = _round_up((rows + 1) // 2, 8)
    return max(8, min(target, half))


# ----------------------------- Pallas kernels ---------------------------------
def _swish(x):
    # x * sigmoid(x) == 0.5 * x * (1 + tanh(x/2)): one EUP transcendental per
    # element (vs exp + reciprocal), numerically stable for all x, f32 math.
    return 0.5 * x * (1.0 + jnp.tanh(0.5 * x))


def _embed_kernel(x_ref, w1_ref, b1_ref, w2_ref, b2_ref, o_ref):
    h = _swish(jnp.dot(x_ref[...].astype(jnp.bfloat16), w1_ref[...],
                       preferred_element_type=jnp.float32) + b1_ref[...])
    o_ref[...] = _swish(jnp.dot(h.astype(jnp.bfloat16), w2_ref[...],
                                preferred_element_type=jnp.float32) + b2_ref[...])


def _proj_kernel(x_ref, w_ref, o_ref):
    # node-rank projection h @ [W1a | W1b]; the halves are gathered to edge
    # rank in glue (hoists the first message matmul off the E-row kernel).
    o_ref[...] = jnp.dot(x_ref[...].astype(jnp.bfloat16), w_ref[...],
                         preferred_element_type=jnp.float32)


def _msg_kernel(hi_ref, hj_ref, es_ref, mask_ref,
                wc_ref, b1_ref, w2_ref, b2_ref, o_ref):
    # message_net_1 with the x_i/x_j products hoisted to node rank; only the
    # tiny K=27 contraction on (u_i-u_j, pos_i-pos_j, vars_i) stays per edge.
    h = _swish(hi_ref[...] + hj_ref[...]
               + jnp.dot(es_ref[...].astype(jnp.bfloat16), wc_ref[...],
                         preferred_element_type=jnp.float32)
               + b1_ref[...])
    msg = _swish(jnp.dot(h.astype(jnp.bfloat16), w2_ref[...],
                         preferred_element_type=jnp.float32) + b2_ref[...])
    # fold the padded-edge mask in here so the segment-sum glue reads msg once
    o_ref[...] = msg * mask_ref[...]


def _upd_kernel(x_ref, agg_ref, var_ref,
                wa_ref, wb_ref, wc_ref, b1_ref, w2_ref, b2_ref, o_ref):
    # update_net_1 split by segment (no [N, 257] concat); n_variables == 1 so
    # vars@W1c collapses to a cheap broadcast multiply on the VPU.
    if wc_ref.shape[0] == 1:
        var_term = var_ref[...] * wc_ref[...]             # [tm,1] * [1,H], f32
    else:
        var_term = jnp.dot(var_ref[...], wc_ref[...],
                           preferred_element_type=jnp.float32)
    h = _swish(
        jnp.dot(x_ref[...].astype(jnp.bfloat16), wa_ref[...],
                preferred_element_type=jnp.float32)
        + jnp.dot(agg_ref[...].astype(jnp.bfloat16), wb_ref[...],
                  preferred_element_type=jnp.float32)
        + var_term + b1_ref[...])
    y = _swish(jnp.dot(h.astype(jnp.bfloat16), w2_ref[...],
                       preferred_element_type=jnp.float32) + b2_ref[...])
    o_ref[...] = x_ref[...] + y     # fused residual; output aliases x in HBM


def _out_kernel(h_ref, ul_ref, w1_ref, b1_ref, w2_ref, b2_ref, dt_ref, o_ref):
    # Conv1d(1,8,16,s=3) -> Swish -> Conv1d(8,1,14), im2col'd into two
    # lane-dense matmuls, with the solver epilogue u[:,-1:] + cumsum(dt)*diff
    # fused so the [*,128] store is unmasked and diff never round-trips HBM.
    hh = _swish(jnp.dot(h_ref[...].astype(jnp.bfloat16), w1_ref[...],
                        preferred_element_type=jnp.float32) + b1_ref[...])
    y = jnp.dot(hh.astype(jnp.bfloat16), w2_ref[...],
                preferred_element_type=jnp.float32) + b2_ref[...]
    o_ref[...] = ul_ref[...] + dt_ref[...] * y


# ----------------------------- pallas_call wrappers ---------------------------
def _cost(m, in_cols, out_cols, matmul_kn, trans_cols, weight_elems):
    flops = 2 * m * sum(k * n for k, n in matmul_kn)
    return pl.CostEstimate(
        flops=int(flops),
        transcendentals=int(m * trans_cols),
        bytes_accessed=int(4 * m * (sum(in_cols) + out_cols) + 2 * weight_elems),
    )


def _row_call(kernel, row_args, const_args, out_cols, *, tm, cost,
              io_aliases=None):
    """Run `kernel` over row tiles; row_args are [Mp, C] (tiled over rows),
    const_args are whole weight/bias arrays pinned to block (0, 0)."""
    mp = row_args[0].shape[0]
    in_specs = ([pl.BlockSpec((tm, a.shape[1]), lambda i: (i, 0))
                 for a in row_args]
                + [pl.BlockSpec(a.shape, lambda i: (0, 0)) for a in const_args])
    return pl.pallas_call(
        kernel,
        out_shape=jax.ShapeDtypeStruct((mp, out_cols), jnp.float32),
        grid_spec=pltpu.PrefetchScalarGridSpec(
            num_scalar_prefetch=0,
            grid=(mp // tm,),
            in_specs=in_specs,
            out_specs=pl.BlockSpec((tm, out_cols), lambda i: (i, 0)),
        ),
        compiler_params=pltpu.CompilerParams(
            dimension_semantics=("parallel",)),
        cost_estimate=cost,
        input_output_aliases=io_aliases if io_aliases is not None else {},
    )(*row_args, *const_args)


def embed_mlp(x, p, *, tm):
    w1, b1, w2, b2 = p
    cost = _cost(x.shape[0], [x.shape[1]], HIDDEN,
                 [(w1.shape[0], HIDDEN), (HIDDEN, HIDDEN)], 2 * HIDDEN,
                 w1.size + w2.size)
    return _row_call(_embed_kernel, [x], [w1, b1, w2, b2], HIDDEN,
                     tm=tm, cost=cost)


def proj_mlp(h, w, *, tm):
    cost = _cost(h.shape[0], [HIDDEN], 2 * HIDDEN,
                 [(HIDDEN, 2 * HIDDEN)], 0, w.size)
    return _row_call(_proj_kernel, [h], [w], 2 * HIDDEN, tm=tm, cost=cost)


def msg_mlp(h_i, h_j, edge_small, edge_mask, p, *, tm):
    consts = [p["m_wc"], p["m_b1"], p["m_w2"], p["m_b2"]]
    m = h_i.shape[0]
    cost = _cost(m, [HIDDEN, HIDDEN, edge_small.shape[1], 1], HIDDEN,
                 [(edge_small.shape[1], HIDDEN), (HIDDEN, HIDDEN)],
                 2 * HIDDEN, sum(c.size for c in consts))
    return _row_call(_msg_kernel, [h_i, h_j, edge_small, edge_mask], consts,
                     HIDDEN, tm=tm, cost=cost)


def upd_mlp(x, agg, variables, p, *, tm):
    consts = [p["u_wa"], p["u_wb"], p["u_wc"], p["u_b1"], p["u_w2"], p["u_b2"]]
    m = x.shape[0]
    cost = _cost(m, [HIDDEN, HIDDEN, variables.shape[1]], HIDDEN,
                 [(HIDDEN, HIDDEN), (HIDDEN, HIDDEN), (HIDDEN, HIDDEN)],
                 2 * HIDDEN, sum(c.size for c in consts))
    # residual x + update written back in place: input 0 (x == h) aliases out 0
    return _row_call(_upd_kernel, [x, agg, variables], consts, HIDDEN,
                     tm=tm, cost=cost, io_aliases={0: 0})


def out_mlp(h, u_last, params, *, tm):
    consts = [params["out_w1e"], params["out_b1e"],
              params["out_w2e"], params["out_b2e"], params["out_dt"]]
    m = h.shape[0]
    cost = _cost(m, [HIDDEN, 1], OUT_PAD,
                 [(HIDDEN, CONV_HIDDEN_PAD), (CONV_HIDDEN_PAD, OUT_PAD)],
                 CONV_HIDDEN_PAD, sum(c.size for c in consts))
    return _row_call(_out_kernel, [h, u_last], consts, OUT_PAD, tm=tm, cost=cost)


# ----------------------------- glue (plain JAX) -------------------------------
def _instance_norm(x, batch, node_mask, inv_cnt, num_graphs, eps=1e-5):
    # PyG InstanceNorm (affine=False, track_running_stats=False, eval):
    # per-graph, per-channel standardization with biased variance; padded rows
    # are masked out of the statistics; per-graph counts are precomputed.
    mean = jax.ops.segment_sum(x * node_mask, batch,
                               num_segments=num_graphs) * inv_cnt
    xc = x - mean[batch]
    var = jax.ops.segment_sum(xc * xc * node_mask, batch,
                              num_segments=num_graphs) * inv_cnt
    return xc / jnp.sqrt(var + eps)[batch]


def mp_pde_forward(params, u, pos, edge_index, batch, num_graphs, *,
                   tm_target=ROW_TILE_TARGET):
    n, tw = u.shape
    e = edge_index.shape[1]
    tm_n = _row_tile(n, tm_target)
    tm_e = _row_tile(e, tm_target)
    n_pad = _round_up(n, tm_n)
    e_pad = _round_up(e, tm_e)
    H = HIDDEN

    # ---- pad rows ONCE; everything stays padded until the final slice -------
    u_p = jnp.pad(u, ((0, n_pad - n), (0, 0)))
    pos_p = jnp.pad(pos, ((0, n_pad - n), (0, 0)))
    batch_p = jnp.pad(batch, (0, n_pad - n))                 # padded -> graph 0
    node_mask = (jnp.arange(n_pad) < n).astype(jnp.float32)[:, None]

    src = jnp.pad(edge_index[0], (0, e_pad - e))             # padded -> node 0
    dst = jnp.pad(edge_index[1], (0, e_pad - e))
    edge_mask = (jnp.arange(e_pad) < e).astype(jnp.float32)[:, None]

    pos_x = pos_p[:, 1:2] / PDE_L
    pos_t = pos_p[:, 0:1] / PDE_TMAX
    variables = pos_t                                        # eq_variables = {}

    node_in = jnp.concatenate([u_p, pos_x, variables], axis=-1)        # [Np, 27]
    # layer-invariant edge features: built once, reused by all 6 GNN layers
    edge_small = jnp.concatenate(
        [u_p[dst] - u_p[src], pos_x[dst] - pos_x[src], variables[dst]],
        axis=-1)                                                       # [Ep, 27]

    # layer-invariant reductions hoisted out of the 6-layer loop
    inv_deg = 1.0 / jnp.maximum(
        jax.ops.segment_sum(edge_mask, dst, num_segments=n_pad), 1.0)  # aggr='mean'
    inv_cnt = 1.0 / jnp.maximum(
        jax.ops.segment_sum(node_mask, batch_p, num_segments=num_graphs), 1.0)

    h = embed_mlp(node_in, params["embedding"], tm=tm_n)

    # PyG convention: edge_index row 0 = source j, row 1 = target i
    for layer_p in params["gnn_layers"]:
        proj = proj_mlp(h, layer_p["m_wab"], tm=tm_n)        # [Np, 2H] node rank
        msg = msg_mlp(proj[dst, :H], proj[src, H:], edge_small, edge_mask,
                      layer_p, tm=tm_e)                      # formula 8 (masked)
        # TODO(synk): fuse this segment mean into msg_mlp via dst-sorted edges
        # and scalar-prefetched per-tile segment offsets.
        agg = jax.ops.segment_sum(msg, dst, num_segments=n_pad) * inv_deg
        h = upd_mlp(h, agg, variables, layer_p, tm=tm_n)     # formula 9 + residual
        h = _instance_norm(h, batch_p, node_mask, inv_cnt, num_graphs)

    out_pad = out_mlp(h, u_p[:, -1:], params, tm=tm_n)       # [Np, 128] lane-dense
    return out_pad[:n, :tw]


# ----------------------------- parameters ------------------------------------
def _linear(key, fan_in, fan_out):
    kw, kb = jax.random.split(key)
    bound = 1.0 / jnp.sqrt(jnp.float32(fan_in))
    w = jax.random.uniform(kw, (fan_in, fan_out), jnp.float32, -bound, bound)
    b = jax.random.uniform(kb, (1, fan_out), jnp.float32, -bound, bound)
    return w, b


def init_params(key):
    tw, H, nv = TIME_WINDOW, HIDDEN, N_VARIABLES
    bf16 = jnp.bfloat16
    keys = jax.random.split(key, 4 + 4 * N_GNN_LAYERS)
    ki = iter(keys)

    params = {}
    # embedding_mlp: Linear(tw+2+len(eq_vars) -> H), Swish, Linear(H->H), Swish
    emb_in = tw + 2 + len(EQ_VARIABLES)
    w1, b1 = _linear(next(ki), emb_in, H)
    w2, b2 = _linear(next(ki), H, H)
    params["embedding"] = (w1.astype(bf16), b1, w2.astype(bf16), b2)

    layers = []
    for _ in range(N_GNN_LAYERS):
        m1_w, m1_b = _linear(next(ki), 2 * H + tw + 1 + nv, H)   # [283, H]
        m2_w, m2_b = _linear(next(ki), H, H)
        u1_w, u1_b = _linear(next(ki), H + H + nv, H)            # [257, H]
        u2_w, u2_b = _linear(next(ki), H, H)
        layers.append({
            # message_net_1 split along cat(x_i, x_j, [u_diff, pos_diff, vars]).
            # The x_i / x_j blocks are packed side by side so one node-rank
            # matmul (h @ m_wab) produces both hoisted terms.
            "m_wab": jnp.concatenate([m1_w[:H], m1_w[H:2 * H]],
                                     axis=1).astype(bf16),       # [H, 2H]
            "m_wc": m1_w[2 * H:].astype(bf16),                   # [27, H]
            "m_b1": m1_b, "m_w2": m2_w.astype(bf16), "m_b2": m2_b,
            # update_net_1 split along cat(x, message, variables)
            "u_wa": u1_w[:H].astype(bf16), "u_wb": u1_w[H:2 * H].astype(bf16),
            "u_wc": u1_w[2 * H:],            # [nv, H] f32; nv==1 -> VPU broadcast
            "u_b1": u1_b, "u_w2": u2_w.astype(bf16), "u_b2": u2_b,
        })
    params["gnn_layers"] = layers

    # output_mlp convs (time_window == 25): Conv1d(1,8,16,stride=3), Conv1d(8,1,14)
    k1, k2 = next(ki), next(ki)
    kw1, kb1 = jax.random.split(k1)
    kw2, kb2 = jax.random.split(k2)
    b1_bound = 1.0 / jnp.sqrt(jnp.float32(1 * 16))
    b2_bound = 1.0 / jnp.sqrt(jnp.float32(8 * 14))
    conv1_w = jax.random.uniform(kw1, (8, 1, 16), jnp.float32, -b1_bound, b1_bound)
    conv1_b = jax.random.uniform(kb1, (8,), jnp.float32, -b1_bound, b1_bound)
    conv2_w = jax.random.uniform(kw2, (1, 8, 14), jnp.float32, -b2_bound, b2_bound)
    conv2_b = jax.random.uniform(kb2, (1,), jnp.float32, -b2_bound, b2_bound)

    # im2col expansion of the two convs over the hidden axis, zero-padded to
    # lane-dense widths (intermediate 304 -> 384, output 25 -> 128).
    L1 = (H - 16) // 3 + 1          # 38
    L2 = L1 - 14 + 1                # 25 == time_window
    assert L2 == tw and L1 * 8 == CONV_HIDDEN
    w1e = jnp.zeros((H, CONV_HIDDEN_PAD), jnp.float32)
    for p in range(L1):
        w1e = w1e.at[p * 3:p * 3 + 16, p * 8:(p + 1) * 8].set(conv1_w[:, 0, :].T)
    b1e = jnp.zeros((1, CONV_HIDDEN_PAD), jnp.float32)
    b1e = b1e.at[0, :CONV_HIDDEN].set(jnp.tile(conv1_b, L1))   # (pos, chan) flatten
    w2e = jnp.zeros((CONV_HIDDEN_PAD, OUT_PAD), jnp.float32)
    blk = conv2_w[0].T.reshape(-1)                             # (k, c) flatten
    for q in range(L2):
        w2e = w2e.at[q * 8:(q + 14) * 8, q].set(blk)
    b2e = jnp.zeros((1, OUT_PAD), jnp.float32).at[0, :L2].set(conv2_b[0])
    dt = PDE_DT * jnp.arange(1, tw + 1, dtype=jnp.float32)     # torch.cumsum(dt)
    dt_pad = jnp.zeros((1, OUT_PAD), jnp.float32).at[0, :tw].set(dt)

    params["out_w1e"], params["out_b1e"] = w1e.astype(bf16), b1e
    params["out_w2e"], params["out_b2e"] = w2e.astype(bf16), b2e
    params["out_dt"] = dt_pad
    return params


# ----------------------------- main -------------------------------------------
if __name__ == "__main__":
    key = jax.random.PRNGKey(0)
    k_par, k_u, k_pos = jax.random.split(key, 3)

    params = init_params(k_par)

    # small synthetic graph: 64 nodes on a ring, each with 4 incoming neighbors
    N = 64
    u = jax.random.normal(k_u, (N, TIME_WINDOW), jnp.float32)
    kx, kt = jax.random.split(k_pos)
    pos = jnp.stack(
        [jax.random.uniform(kt, (N,), jnp.float32, 0.0, PDE_TMAX),   # pos[:,0] = t
         jax.random.uniform(kx, (N,), jnp.float32, 0.0, PDE_L)],     # pos[:,1] = x
        axis=-1)
    idx = jnp.arange(N)
    offsets = jnp.array([-2, -1, 1, 2])
    src = ((idx[None, :] + offsets[:, None]) % N).reshape(-1)
    dst = jnp.tile(idx, 4)
    edge_index = jnp.stack([src, dst]).astype(jnp.int32)             # [2, 256]
    batch = jnp.zeros((N,), jnp.int32)                               # single graph

    fwd = jax.jit(functools.partial(mp_pde_forward, num_graphs=1))
    out = fwd(params, u, pos, edge_index, batch)
    out = jax.block_until_ready(out)
    assert out.shape == (N, TIME_WINDOW)
    assert bool(jnp.all(jnp.isfinite(out)))
    print("KERNEL_OK")
</pallas_src>

<mosaic_0001>
module attributes {stable_mosaic.version = 11 : i64} {
  func.func private @main(%arg0: i32) attributes {dimension_semantics = [#tpu.dimension_semantics<core_parallel>], iteration_bounds = array<i64: 2>, tpu.core_type = #tpu.core_type<sc_scalar_subcore>, window_params = []} {
    return
  }
}

module attributes {stable_mosaic.version = 11 : i64} {
  func.func private @main(%arg0: i32) attributes {dimension_semantics = [#tpu.dimension_semantics<core_parallel>], iteration_bounds = array<i64: 2>, tpu.core_type = #tpu.core_type<sc_scalar_subcore>, window_params = []} {
    return
  }
}

module attributes {stable_mosaic.version = 11 : i64} {
  func.func @_embed_kernel(%arg0: i32, %arg1: memref<32x27xf32, #tpu.memory_space<vmem>>, %arg2: memref<27x128xbf16, #tpu.memory_space<vmem>>, %arg3: memref<1x128xf32, #tpu.memory_space<vmem>>, %arg4: memref<128x128xbf16, #tpu.memory_space<vmem>>, %arg5: memref<1x128xf32, #tpu.memory_space<vmem>>, %arg6: memref<32x128xf32, #tpu.memory_space<vmem>>) attributes {dimension_semantics = [#tpu.dimension_semantics<parallel>], iteration_bounds = array<i64: 2>, scalar_prefetch = 0 : i64, scratch_operands = 0 : i64, tpu.core_type = #tpu.core_type<tc>, window_params = [{transform_indices = @transform_0, window_bounds = array<i64: 32, 27>}, {pipeline_mode = #tpu.pipeline_mode<synchronous>, transform_indices = @transform_1, window_bounds = array<i64: 27, 128>}, {pipeline_mode = #tpu.pipeline_mode<synchronous>, transform_indices = @transform_2, window_bounds = array<i64: 1, 128>}, {pipeline_mode = #tpu.pipeline_mode<synchronous>, transform_indices = @transform_3, window_bounds = array<i64: 128, 128>}, {pipeline_mode = #tpu.pipeline_mode<synchronous>, transform_indices = @transform_4, window_bounds = array<i64: 1, 128>}, {transform_indices = @transform_5, window_bounds = array<i64: 32, 128>}]} {
    %c0 = arith.constant 0 : index
    %c0_0 = arith.constant 0 : index
    %0 = vector.load %arg1[%c0, %c0_0] : memref<32x27xf32, #tpu.memory_space<vmem>>, vector<32x27xf32>
    %1 = arith.truncf %0 : vector<32x27xf32> to vector<32x27xbf16>
    %c0_1 = arith.constant 0 : index
    %c0_2 = arith.constant 0 : index
    %2 = vector.load %arg2[%c0_1, %c0_2] : memref<27x128xbf16, #tpu.memory_space<vmem>>, vector<27x128xbf16>
    %cst = arith.constant dense<0.000000e+00> : vector<32x128xf32>
    %3 = tpu.matmul %1, %2, %cst {dimension_numbers = #tpu.dot_dimension_numbers<[1], [0], [0], [1], [0, 0, 1, 1], [], []>} : vector<32x27xbf16>, vector<27x128xbf16>, vector<32x128xf32> -> vector<32x128xf32>
    %c0_3 = arith.constant 0 : index
    %c0_4 = arith.constant 0 : index
    %4 = vector.load %arg3[%c0_3, %c0_4] : memref<1x128xf32, #tpu.memory_space<vmem>>, vector<1x128xf32>
    %5 = vector.broadcast %4 : vector<1x128xf32> to vector<32x128xf32>
    %6 = arith.addf %3, %5 : vector<32x128xf32>
    %cst_5 = arith.constant 5.000000e-01 : f32
    %7 = vector.broadcast %cst_5 : f32 to vector<32x128xf32>
    %8 = arith.mulf %7, %6 : vector<32x128xf32>
    %cst_6 = arith.constant 5.000000e-01 : f32
    %9 = vector.broadcast %cst_6 : f32 to vector<32x128xf32>
    %10 = arith.mulf %9, %6 : vector<32x128xf32>
    %11 = math.tanh %10 : vector<32x128xf32>
    %cst_7 = arith.constant 1.000000e+00 : f32
    %12 = vector.broadcast %cst_7 : f32 to vector<32x128xf32>
    %13 = arith.addf %12, %11 : vector<32x128xf32>
    %14 = arith.mulf %8, %13 : vector<32x128xf32>
    %15 = arith.truncf %14 : vector<32x128xf32> to vector<32x128xbf16>
    %c0_8 = arith.constant 0 : index
    %c0_9 = arith.constant 0 : index
    %16 = vector.load %arg4[%c0_8, %c0_9] : memref<128x128xbf16, #tpu.memory_space<vmem>>, vector<128x128xbf16>
    %cst_10 = arith.constant dense<0.000000e+00> : vector<32x128xf32>
    %17 = tpu.matmul %15, %16, %cst_10 {dimension_numbers = #tpu.dot_dimension_numbers<[1], [0], [0], [1], [0, 0, 1, 1], [], []>} : vector<32x128xbf16>, vector<128x128xbf16>, vector<32x128xf32> -> vector<32x128xf32>
    %c0_11 = arith.constant 0 : index
    %c0_12 = arith.constant 0 : index
    %18 = vector.load %arg5[%c0_11, %c0_12] : memref<1x128xf32, #tpu.memory_space<vmem>>, vector<1x128xf32>
    %19 = vector.broadcast %18 : vector<1x128xf32> to vector<32x128xf32>
    %20 = arith.addf %17, %19 : vector<32x128xf32>
    %cst_13 = arith.constant 5.000000e-01 : f32
    %21 = vector.broadcast %cst_13 : f32 to vector<32x128xf32>
    %22 = arith.mulf %21, %20 : vector<32x128xf32>
    %cst_14 = arith.constant 5.000000e-01 : f32
    %23 = vector.broadcast %cst_14 : f32 to vector<32x128xf32>
    %24 = arith.mulf %23, %20 : vector<32x128xf32>
    %25 = math.tanh %24 : vector<32x128xf32>
    %cst_15 = arith.constant 1.000000e+00 : f32
    %26 = vector.broadcast %cst_15 : f32 to vector<32x128xf32>
    %27 = arith.addf %26, %25 : vector<32x128xf32>
    %28 = arith.mulf %22, %27 : vector<32x128xf32>
    %c0_16 = arith.constant 0 : index
    %c0_17 = arith.constant 0 : index
    %29 = vector.load %arg6[%c0_16, %c0_17] : memref<32x128xf32, #tpu.memory_space<vmem>>, vector<32x128xf32>
    tpu.vector_store %arg6[%c0_16, %c0_17], %28 {strides = array<i32>} : memref<32x128xf32, #tpu.memory_space<vmem>>, vector<32x128xf32>,
    return
  }
  func.func @transform_0(%arg0: i32) -> (i32, i32) {
    %c0_i32 = arith.constant 0 : i32
    %c0_i32_0 = arith.constant 0 : i32
    return %arg0, %c0_i32 : i32, i32
  }
  func.func @transform_1(%arg0: i32) -> (i32, i32) {
    %c0_i32 = arith.constant 0 : i32
    %c0_i32_0 = arith.constant 0 : i32
    %c0_i32_1 = arith.constant 0 : i32
    return %c0_i32, %c0_i32_0 : i32, i32
  }
  func.func @transform_2(%arg0: i32) -> (i32, i32) {
    %c0_i32 = arith.constant 0 : i32
    %c0_i32_0 = arith.constant 0 : i32
    %c0_i32_1 = arith.constant 0 : i32
    return %c0_i32, %c0_i32_0 : i32, i32
  }
  func.func @transform_3(%arg0: i32) -> (i32, i32) {
    %c0_i32 = arith.constant 0 : i32
    %c0_i32_0 = arith.constant 0 : i32
    %c0_i32_1 = arith.constant 0 : i32
    return %c0_i32, %c0_i32_0 : i32, i32
  }
  func.func @transform_4(%arg0: i32) -> (i32, i32) {
    %c0_i32 = arith.constant 0 : i32
    %c0_i32_0 = arith.constant 0 : i32
    %c0_i32_1 = arith.constant 0 : i32
    return %c0_i32, %c0_i32_0 : i32, i32
  }
  func.func @transform_5(%arg0: i32) -> (i32, i32) {
    %c0_i32 = arith.constant 0 : i32
    %c0_i32_0 = arith.constant 0 : i32
    return %arg0, %c0_i32 : i32, i32
  }
}

module attributes {stable_mosaic.version = 11 : i64} {
  func.func @_proj_kernel(%arg0: i32, %arg1: memref<32x128xf32, #tpu.memory_space<vmem>>, %arg2: memref<128x256xbf16, #tpu.memory_space<vmem>>, %arg3: memref<32x256xf32, #tpu.memory_space<vmem>>) attributes {dimension_semantics = [#tpu.dimension_semantics<parallel>], iteration_bounds = array<i64: 2>, scalar_prefetch = 0 : i64, scratch_operands = 0 : i64, tpu.core_type = #tpu.core_type<tc>, window_params = [{transform_indices = @transform_0, window_bounds = array<i64: 32, 128>}, {pipeline_mode = #tpu.pipeline_mode<synchronous>, transform_indices = @transform_1, window_bounds = array<i64: 128, 256>}, {transform_indices = @transform_2, window_bounds = array<i64: 32, 256>}]} {
    %c0 = arith.constant 0 : index
    %c0_0 = arith.constant 0 : index
    %0 = vector.load %arg1[%c0, %c0_0] : memref<32x128xf32, #tpu.memory_space<vmem>>, vector<32x128xf32>
    %1 = arith.truncf %0 : vector<32x128xf32> to vector<32x128xbf16>
    %c0_1 = arith.constant 0 : index
    %c0_2 = arith.constant 0 : index
    %2 = vector.load %arg2[%c0_1, %c0_2] : memref<128x256xbf16, #tpu.memory_space<vmem>>, vector<128x256xbf16>
    %cst = arith.constant dense<0.000000e+00> : vector<32x256xf32>
    %3 = tpu.matmul %1, %2, %cst {dimension_numbers = #tpu.dot_dimension_numbers<[1], [0], [0], [1], [0, 0, 1, 1], [], []>} : vector<32x128xbf16>, vector<128x256xbf16>, vector<32x256xf32> -> vector<32x256xf32>
    %c0_3 = arith.constant 0 : index
    %c0_4 = arith.constant 0 : index
    %4 = vector.load %arg3[%c0_3, %c0_4] : memref<32x256xf32, #tpu.memory_space<vmem>>, vector<32x256xf32>
    tpu.vector_store %arg3[%c0_3, %c0_4], %3 {strides = array<i32>} : memref<32x256xf32, #tpu.memory_space<vmem>>, vector<32x256xf32>,
    return
  }
  func.func @transform_0(%arg0: i32) -> (i32, i32) {
    %c0_i32 = arith.constant 0 : i32
    %c0_i32_0 = arith.constant 0 : i32
    return %arg0, %c0_i32 : i32, i32
  }
  func.func @transform_1(%arg0: i32) -> (i32, i32) {
    %c0_i32 = arith.constant 0 : i32
    %c0_i32_0 = arith.constant 0 : i32
    %c0_i32_1 = arith.constant 0 : i32
    return %c0_i32, %c0_i32_0 : i32, i32
  }
  func.func @transform_2(%arg0: i32) -> (i32, i32) {
    %c0_i32 = arith.constant 0 : i32
    %c0_i32_0 = arith.constant 0 : i32
    return %arg0, %c0_i32 : i32, i32
  }
}

module attributes {stable_mosaic.version = 11 : i64} {
  func.func @_msg_kernel(%arg0: i32, %arg1: memref<128x128xf32, #tpu.memory_space<vmem>>, %arg2: memref<128x128xf32, #tpu.memory_space<vmem>>, %arg3: memref<128x27xf32, #tpu.memory_space<vmem>>, %arg4: memref<128x1xf32, #tpu.memory_space<vmem>>, %arg5: memref<27x128xbf16, #tpu.memory_space<vmem>>, %arg6: memref<1x128xf32, #tpu.memory_space<vmem>>, %arg7: memref<128x128xbf16, #tpu.memory_space<vmem>>, %arg8: memref<1x128xf32, #tpu.memory_space<vmem>>, %arg9: memref<128x128xf32, #tpu.memory_space<vmem>>) attributes {dimension_semantics = [#tpu.dimension_semantics<parallel>], iteration_bounds = array<i64: 2>, scalar_prefetch = 0 : i64, scratch_operands = 0 : i64, tpu.core_type = #tpu.core_type<tc>, window_params = [{transform_indices = @transform_0, window_bounds = array<i64: 128, 128>}, {transform_indices = @transform_1, window_bounds = array<i64: 128, 128>}, {transform_indices = @transform_2, window_bounds = array<i64: 128, 27>}, {transform_indices = @transform_3, window_bounds = array<i64: 128, 1>}, {pipeline_mode = #tpu.pipeline_mode<synchronous>, transform_indices = @transform_4, window_bounds = array<i64: 27, 128>}, {pipeline_mode = #tpu.pipeline_mode<synchronous>, transform_indices = @transform_5, window_bounds = array<i64: 1, 128>}, {pipeline_mode = #tpu.pipeline_mode<synchronous>, transform_indices = @transform_6, window_bounds = array<i64: 128, 128>}, {pipeline_mode = #tpu.pipeline_mode<synchronous>, transform_indices = @transform_7, window_bounds = array<i64: 1, 128>}, {transform_indices = @transform_8, window_bounds = array<i64: 128, 128>}]} {
    %c0 = arith.constant 0 : index
    %c0_0 = arith.constant 0 : index
    %0 = vector.load %arg1[%c0, %c0_0] : memref<128x128xf32, #tpu.memory_space<vmem>>, vector<128x128xf32>
    %c0_1 = arith.constant 0 : index
    %c0_2 = arith.constant 0 : index
    %1 = vector.load %arg2[%c0_1, %c0_2] : memref<128x128xf32, #tpu.memory_space<vmem>>, vector<128x128xf32>
    %2 = arith.addf %0, %1 : vector<128x128xf32>
    %c0_3 = arith.constant 0 : index
    %c0_4 = arith.constant 0 : index
    %3 = vector.load %arg3[%c0_3, %c0_4] : memref<128x27xf32, #tpu.memory_space<vmem>>, vector<128x27xf32>
    %4 = arith.truncf %3 : vector<128x27xf32> to vector<128x27xbf16>
    %c0_5 = arith.constant 0 : index
    %c0_6 = arith.constant 0 : index
    %5 = vector.load %arg5[%c0_5, %c0_6] : memref<27x128xbf16, #tpu.memory_space<vmem>>, vector<27x128xbf16>
    %cst = arith.constant dense<0.000000e+00> : vector<128x128xf32>
    %6 = tpu.matmul %4, %5, %cst {dimension_numbers = #tpu.dot_dimension_numbers<[1], [0], [0], [1], [0, 0, 1, 1], [], []>} : vector<128x27xbf16>, vector<27x128xbf16>, vector<128x128xf32> -> vector<128x128xf32>
    %7 = arith.addf %2, %6 : vector<128x128xf32>
    %c0_7 = arith.constant 0 : index
    %c0_8 = arith.constant 0 : index
    %8 = vector.load %arg6[%c0_7, %c0_8] : memref<1x128xf32, #tpu.memory_space<vmem>>, vector<1x128xf32>
    %9 = vector.broadcast %8 : vector<1x128xf32> to vector<128x128xf32>
    %10 = arith.addf %7, %9 : vector<128x128xf32>
    %cst_9 = arith.constant 5.000000e-01 : f32
    %11 = vector.broadcast %cst_9 : f32 to vector<128x128xf32>
    %12 = arith.mulf %11, %10 : vector<128x128xf32>
    %cst_10 = arith.constant 5.000000e-01 : f32
    %13 = vector.broadcast %cst_10 : f32 to vector<128x128xf32>
    %14 = arith.mulf %13, %10 : vector<128x128xf32>
    %15 = math.tanh %14 : vector<128x128xf32>
    %cst_11 = arith.constant 1.000000e+00 : f32
    %16 = vector.broadcast %cst_11 : f32 to vector<128x128xf32>
    %17 = arith.addf %16, %15 : vector<128x128xf32>
    %18 = arith.mulf %12, %17 : vector<128x128xf32>
    %19 = arith.truncf %18 : vector<128x128xf32> to vector<128x128xbf16>
    %c0_12 = arith.constant 0 : index
    %c0_13 = arith.constant 0 : index
    %20 = vector.load %arg7[%c0_12, %c0_13] : memref<128x128xbf16, #tpu.memory_space<vmem>>, vector<128x128xbf16>
    %cst_14 = arith.constant dense<0.000000e+00> : vector<128x128xf32>
    %21 = tpu.matmul %19, %20, %cst_14 {dimension_numbers = #tpu.dot_dimension_numbers<[1], [0], [0], [1], [0, 0, 1, 1], [], []>} : vector<128x128xbf16>, vector<128x128xbf16>, vector<128x128xf32> -> vector<128x128xf32>
    %c0_15 = arith.constant 0 : index
    %c0_16 = arith.constant 0 : index
    %22 = vector.load %arg8[%c0_15, %c0_16] : memref<1x128xf32, #tpu.memory_space<vmem>>, vector<1x128xf32>
    %23 = vector.broadcast %22 : vector<1x128xf32> to vector<128x128xf32>
    %24 = arith.addf %21, %23 : vector<128x128xf32>
    %cst_17 = arith.constant 5.000000e-01 : f32
    %25 = vector.broadcast %cst_17 : f32 to vector<128x128xf32>
    %26 = arith.mulf %25, %24 : vector<128x128xf32>
    %cst_18 = arith.constant 5.000000e-01 : f32
    %27 = vector.broadcast %cst_18 : f32 to vector<128x128xf32>
    %28 = arith.mulf %27, %24 : vector<128x128xf32>
    %29 = math.tanh %28 : vector<128x128xf32>
    %cst_19 = arith.constant 1.000000e+00 : f32
    %30 = vector.broadcast %cst_19 : f32 to vector<128x128xf32>
    %31 = arith.addf %30, %29 : vector<128x128xf32>
    %32 = arith.mulf %26, %31 : vector<128x128xf32>
    %c0_20 = arith.constant 0 : index
    %c0_21 = arith.constant 0 : index
    %33 = vector.load %arg4[%c0_20, %c0_21] : memref<128x1xf32, #tpu.memory_space<vmem>>, vector<128x1xf32>
    %34 = vector.broadcast %33 : vector<128x1xf32> to vector<128x128xf32>
    %35 = arith.mulf %32, %34 : vector<128x128xf32>
    %c0_22 = arith.constant 0 : index
    %c0_23 = arith.constant 0 : index
    %36 = vector.load %arg9[%c0_22, %c0_23] : memref<128x128xf32, #tpu.memory_space<vmem>>, vector<128x128xf32>
    tpu.vector_store %arg9[%c0_22, %c0_23], %35 {strides = array<i32>} : memref<128x128xf32, #tpu.memory_space<vmem>>, vector<128x128xf32>,
    return
  }
  func.func @transform_0(%arg0: i32) -> (i32, i32) {
    %c0_i32 = arith.constant 0 : i32
    %c0_i32_0 = arith.constant 0 : i32
    return %arg0, %c0_i32 : i32, i32
  }
  func.func @transform_1(%arg0: i32) -> (i32, i32) {
    %c0_i32 = arith.constant 0 : i32
    %c0_i32_0 = arith.constant 0 : i32
    return %arg0, %c0_i32 : i32, i32
  }
  func.func @transform_2(%arg0: i32) -> (i32, i32) {
    %c0_i32 = arith.constant 0 : i32
    %c0_i32_0 = arith.constant 0 : i32
    return %arg0, %c0_i32 : i32, i32
  }
  func.func @transform_3(%arg0: i32) -> (i32, i32) {
    %c0_i32 = arith.constant 0 : i32
    %c0_i32_0 = arith.constant 0 : i32
    return %arg0, %c0_i32 : i32, i32
  }
  func.func @transform_4(%arg0: i32) -> (i32, i32) {
    %c0_i32 = arith.constant 0 : i32
    %c0_i32_0 = arith.constant 0 : i32
    %c0_i32_1 = arith.constant 0 : i32
    return %c0_i32, %c0_i32_0 : i32, i32
  }
  func.func @transform_5(%arg0: i32) -> (i32, i32) {
    %c0_i32 = arith.constant 0 : i32
    %c0_i32_0 = arith.constant 0 : i32
    %c0_i32_1 = arith.constant 0 : i32
    return %c0_i32, %c0_i32_0 : i32, i32
  }
  func.func @transform_6(%arg0: i32) -> (i32, i32) {
    %c0_i32 = arith.constant 0 : i32
    %c0_i32_0 = arith.constant 0 : i32
    %c0_i32_1 = arith.constant 0 : i32
    return %c0_i32, %c0_i32_0 : i32, i32
  }
  func.func @transform_7(%arg0: i32) -> (i32, i32) {
    %c0_i32 = arith.constant 0 : i32
    %c0_i32_0 = arith.constant 0 : i32
    %c0_i32_1 = arith.constant 0 : i32
    return %c0_i32, %c0_i32_0 : i32, i32
  }
  func.func @transform_8(%arg0: i32) -> (i32, i32) {
    %c0_i32 = arith.constant 0 : i32
    %c0_i32_0 = arith.constant 0 : i32
    return %arg0, %c0_i32 : i32, i32
  }
}

module attributes {stable_mosaic.version = 11 : i64} {
  func.func @_upd_kernel(%arg0: i32, %arg1: memref<32x128xf32, #tpu.memory_space<vmem>>, %arg2: memref<32x128xf32, #tpu.memory_space<vmem>>, %arg3: memref<32x1xf32, #tpu.memory_space<vmem>>, %arg4: memref<128x128xbf16, #tpu.memory_space<vmem>>, %arg5: memref<128x128xbf16, #tpu.memory_space<vmem>>, %arg6: memref<1x128xf32, #tpu.memory_space<vmem>>, %arg7: memref<1x128xf32, #tpu.memory_space<vmem>>, %arg8: memref<128x128xbf16, #tpu.memory_space<vmem>>, %arg9: memref<1x128xf32, #tpu.memory_space<vmem>>, %arg10: memref<32x128xf32, #tpu.memory_space<vmem>>) attributes {dimension_semantics = [#tpu.dimension_semantics<parallel>], iteration_bounds = array<i64: 2>, scalar_prefetch = 0 : i64, scratch_operands = 0 : i64, tpu.core_type = #tpu.core_type<tc>, window_params = [{transform_indices = @transform_0, window_bounds = array<i64: 32, 128>}, {transform_indices = @transform_1, window_bounds = array<i64: 32, 128>}, {transform_indices = @transform_2, window_bounds = array<i64: 32, 1>}, {pipeline_mode = #tpu.pipeline_mode<synchronous>, transform_indices = @transform_3, window_bounds = array<i64: 128, 128>}, {pipeline_mode = #tpu.pipeline_mode<synchronous>, transform_indices = @transform_4, window_bounds = array<i64: 128, 128>}, {pipeline_mode = #tpu.pipeline_mode<synchronous>, transform_indices = @transform_5, window_bounds = array<i64: 1, 128>}, {pipeline_mode = #tpu.pipeline_mode<synchronous>, transform_indices = @transform_6, window_bounds = array<i64: 1, 128>}, {pipeline_mode = #tpu.pipeline_mode<synchronous>, transform_indices = @transform_7, window_bounds = array<i64: 128, 128>}, {pipeline_mode = #tpu.pipeline_mode<synchronous>, transform_indices = @transform_8, window_bounds = array<i64: 1, 128>}, {transform_indices = @transform_9, window_bounds = array<i64: 32, 128>}]} {
    %c0 = arith.constant 0 : index
    %c0_0 = arith.constant 0 : index
    %0 = vector.load %arg3[%c0, %c0_0] : memref<32x1xf32, #tpu.memory_space<vmem>>, vector<32x1xf32>
    %c0_1 = arith.constant 0 : index
    %c0_2 = arith.constant 0 : index
    %1 = vector.load %arg6[%c0_1, %c0_2] : memref<1x128xf32, #tpu.memory_space<vmem>>, vector<1x128xf32>
    %2 = vector.broadcast %0 : vector<32x1xf32> to vector<32x128xf32>
    %3 = vector.broadcast %1 : vector<1x128xf32> to vector<32x128xf32>
    %4 = arith.mulf %2, %3 : vector<32x128xf32>
    %c0_3 = arith.constant 0 : index
    %c0_4 = arith.constant 0 : index
    %5 = vector.load %arg1[%c0_3, %c0_4] : memref<32x128xf32, #tpu.memory_space<vmem>>, vector<32x128xf32>
    %6 = arith.truncf %5 : vector<32x128xf32> to vector<32x128xbf16>
    %c0_5 = arith.constant 0 : index
    %c0_6 = arith.constant 0 : index
    %7 = vector.load %arg4[%c0_5, %c0_6] : memref<128x128xbf16, #tpu.memory_space<vmem>>, vector<128x128xbf16>
    %cst = arith.constant dense<0.000000e+00> : vector<32x128xf32>
    %8 = tpu.matmul %6, %7, %cst {dimension_numbers = #tpu.dot_dimension_numbers<[1], [0], [0], [1], [0, 0, 1, 1], [], []>} : vector<32x128xbf16>, vector<128x128xbf16>, vector<32x128xf32> -> vector<32x128xf32>
    %c0_7 = arith.constant 0 : index
    %c0_8 = arith.constant 0 : index
    %9 = vector.load %arg2[%c0_7, %c0_8] : memref<32x128xf32, #tpu.memory_space<vmem>>, vector<32x128xf32>
    %10 = arith.truncf %9 : vector<32x128xf32> to vector<32x128xbf16>
    %c0_9 = arith.constant 0 : index
    %c0_10 = arith.constant 0 : index
    %11 = vector.load %arg5[%c0_9, %c0_10] : memref<128x128xbf16, #tpu.memory_space<vmem>>, vector<128x128xbf16>
    %cst_11 = arith.constant dense<0.000000e+00> : vector<32x128xf32>
    %12 = tpu.matmul %10, %11, %cst_11 {dimension_numbers = #tpu.dot_dimension_numbers<[1], [0], [0], [1], [0, 0, 1, 1], [], []>} : vector<32x128xbf16>, vector<128x128xbf16>, vector<32x128xf32> -> vector<32x128xf32>
    %13 = arith.addf %8, %12 : vector<32x128xf32>
    %14 = arith.addf %13, %4 : vector<32x128xf32>
    %c0_12 = arith.constant 0 : index
    %c0_13 = arith.constant 0 : index
    %15 = vector.load %arg7[%c0_12, %c0_13] : memref<1x128xf32, #tpu.memory_space<vmem>>, vector<1x128xf32>
    %16 = vector.broadcast %15 : vector<1x128xf32> to vector<32x128xf32>
    %17 = arith.addf %14, %16 : vector<32x128xf32>
    %cst_14 = arith.constant 5.000000e-01 : f32
    %18 = vector.broadcast %cst_14 : f32 to vector<32x128xf32>
    %19 = arith.mulf %18, %17 : vector<32x128xf32>
    %cst_15 = arith.constant 5.000000e-01 : f32
    %20 = vector.broadcast %cst_15 : f32 to vector<32x128xf32>
    %21 = arith.mulf %20, %17 : vector<32x128xf32>
    %22 = math.tanh %21 : vector<32x128xf32>
    %cst_16 = arith.constant 1.000000e+00 : f32
    %23 = vector.broadcast %cst_16 : f32 to vector<32x128xf32>
    %24 = arith.addf %23, %22 : vector<32x128xf32>
    %25 = arith.mulf %19, %24 : vector<32x128xf32>
    %26 = arith.truncf %25 : vector<32x128xf32> to vector<32x128xbf16>
    %c0_17 = arith.constant 0 : index
    %c0_18 = arith.constant 0 : index
    %27 = vector.load %arg8[%c0_17, %c0_18] : memref<128x128xbf16, #tpu.memory_space<vmem>>, vector<128x128xbf16>
    %cst_19 = arith.constant dense<0.000000e+00> : vector<32x128xf32>
    %28 = tpu.matmul %26, %27, %cst_19 {dimension_numbers = #tpu.dot_dimension_numbers<[1], [0], [0], [1], [0, 0, 1, 1], [], []>} : vector<32x128xbf16>, vector<128x128xbf16>, vector<32x128xf32> -> vector<32x128xf32>
    %c0_20 = arith.constant 0 : index
    %c0_21 = arith.constant 0 : index
    %29 = vector.load %arg9[%c0_20, %c0_21] : memref<1x128xf32, #tpu.memory_space<vmem>>, vector<1x128xf32>
    %30 = vector.broadcast %29 : vector<1x128xf32> to vector<32x128xf32>
    %31 = arith.addf %28, %30 : vector<32x128xf32>
    %cst_22 = arith.constant 5.000000e-01 : f32
    %32 = vector.broadcast %cst_22 : f32 to vector<32x128xf32>
    %33 = arith.mulf %32, %31 : vector<32x128xf32>
    %cst_23 = arith.constant 5.000000e-01 : f32
    %34 = vector.broadcast %cst_23 : f32 to vector<32x128xf32>
    %35 = arith.mulf %34, %31 : vector<32x128xf32>
    %36 = math.tanh %35 : vector<32x128xf32>
    %cst_24 = arith.constant 1.000000e+00 : f32
    %37 = vector.broadcast %cst_24 : f32 to vector<32x128xf32>
    %38 = arith.addf %37, %36 : vector<32x128xf32>
    %39 = arith.mulf %33, %38 : vector<32x128xf32>
    %c0_25 = arith.constant 0 : index
    %c0_26 = arith.constant 0 : index
    %40 = vector.load %arg1[%c0_25, %c0_26] : memref<32x128xf32, #tpu.memory_space<vmem>>, vector<32x128xf32>
    %41 = arith.addf %40, %39 : vector<32x128xf32>
    %c0_27 = arith.constant 0 : index
    %c0_28 = arith.constant 0 : index
    %42 = vector.load %arg10[%c0_27, %c0_28] : memref<32x128xf32, #tpu.memory_space<vmem>>, vector<32x128xf32>
    tpu.vector_store %arg10[%c0_27, %c0_28], %41 {strides = array<i32>} : memref<32x128xf32, #tpu.memory_space<vmem>>, vector<32x128xf32>,
    return
  }
  func.func @transform_0(%arg0: i32) -> (i32, i32) {
    %c0_i32 = arith.constant 0 : i32
    %c0_i32_0 = arith.constant 0 : i32
    return %arg0, %c0_i32 : i32, i32
  }
  func.func @transform_1(%arg0: i32) -> (i32, i32) {
    %c0_i32 = arith.constant 0 : i32
    %c0_i32_0 = arith.constant 0 : i32
    return %arg0, %c0_i32 : i32, i32
  }
  func.func @transform_2(%arg0: i32) -> (i32, i32) {
    %c0_i32 = arith.constant 0 : i32
    %c0_i32_0 = arith.constant 0 : i32
    return %arg0, %c0_i32 : i32, i32
  }
  func.func @transform_3(%arg0: i32) -> (i32, i32) {
    %c0_i32 = arith.constant 0 : i32
    %c0_i32_0 = arith.constant 0 : i32
    %c0_i32_1 = arith.constant 0 : i32
    return %c0_i32, %c0_i32_0 : i32, i32
  }
  func.func @transform_4(%arg0: i32) -> (i32, i32) {
    %c0_i32 = arith.constant 0 : i32
    %c0_i32_0 = arith.constant 0 : i32
    %c0_i32_1 = arith.constant 0 : i32
    return %c0_i32, %c0_i32_0 : i32, i32
  }
  func.func @transform_5(%arg0: i32) -> (i32, i32) {
    %c0_i32 = arith.constant 0 : i32
    %c0_i32_0 = arith.constant 0 : i32
    %c0_i32_1 = arith.constant 0 : i32
    return %c0_i32, %c0_i32_0 : i32, i32
  }
  func.func @transform_6(%arg0: i32) -> (i32, i32) {
    %c0_i32 = arith.constant 0 : i32
    %c0_i32_0 = arith.constant 0 : i32
    %c0_i32_1 = arith.constant 0 : i32
    return %c0_i32, %c0_i32_0 : i32, i32
  }
  func.func @transform_7(%arg0: i32) -> (i32, i32) {
    %c0_i32 = arith.constant 0 : i32
    %c0_i32_0 = arith.constant 0 : i32
    %c0_i32_1 = arith.constant 0 : i32
    return %c0_i32, %c0_i32_0 : i32, i32
  }
  func.func @transform_8(%arg0: i32) -> (i32, i32) {
    %c0_i32 = arith.constant 0 : i32
    %c0_i32_0 = arith.constant 0 : i32
    %c0_i32_1 = arith.constant 0 : i32
    return %c0_i32, %c0_i32_0 : i32, i32
  }
  func.func @transform_9(%arg0: i32) -> (i32, i32) {
    %c0_i32 = arith.constant 0 : i32
    %c0_i32_0 = arith.constant 0 : i32
    return %arg0, %c0_i32 : i32, i32
  }
}

module attributes {stable_mosaic.version = 11 : i64} {
  func.func @_out_kernel(%arg0: i32, %arg1: memref<32x128xf32, #tpu.memory_space<vmem>>, %arg2: memref<32x1xf32, #tpu.memory_space<vmem>>, %arg3: memref<128x384xbf16, #tpu.memory_space<vmem>>, %arg4: memref<1x384xf32, #tpu.memory_space<vmem>>, %arg5: memref<384x128xbf16, #tpu.memory_space<vmem>>, %arg6: memref<1x128xf32, #tpu.memory_space<vmem>>, %arg7: memref<1x128xf32, #tpu.memory_space<vmem>>, %arg8: memref<32x128xf32, #tpu.memory_space<vmem>>) attributes {dimension_semantics = [#tpu.dimension_semantics<parallel>], iteration_bounds = array<i64: 2>, scalar_prefetch = 0 : i64, scratch_operands = 0 : i64, tpu.core_type = #tpu.core_type<tc>, window_params = [{transform_indices = @transform_0, window_bounds = array<i64: 32, 128>}, {transform_indices = @transform_1, window_bounds = array<i64: 32, 1>}, {pipeline_mode = #tpu.pipeline_mode<synchronous>, transform_indices = @transform_2, window_bounds = array<i64: 128, 384>}, {pipeline_mode = #tpu.pipeline_mode<synchronous>, transform_indices = @transform_3, window_bounds = array<i64: 1, 384>}, {pipeline_mode = #tpu.pipeline_mode<synchronous>, transform_indices = @transform_4, window_bounds = array<i64: 384, 128>}, {pipeline_mode = #tpu.pipeline_mode<synchronous>, transform_indices = @transform_5, window_bounds = array<i64: 1, 128>}, {pipeline_mode = #tpu.pipeline_mode<synchronous>, transform_indices = @transform_6, window_bounds = array<i64: 1, 128>}, {transform_indices = @transform_7, window_bounds = array<i64: 32, 128>}]} {
    %c0 = arith.constant 0 : index
    %c0_0 = arith.constant 0 : index
    %0 = vector.load %arg1[%c0, %c0_0] : memref<32x128xf32, #tpu.memory_space<vmem>>, vector<32x128xf32>
    %1 = arith.truncf %0 : vector<32x128xf32> to vector<32x128xbf16>
    %c0_1 = arith.constant 0 : index
    %c0_2 = arith.constant 0 : index
    %2 = vector.load %arg3[%c0_1, %c0_2] : memref<128x384xbf16, #tpu.memory_space<vmem>>, vector<128x384xbf16>
    %cst = arith.constant dense<0.000000e+00> : vector<32x384xf32>
    %3 = tpu.matmul %1, %2, %cst {dimension_numbers = #tpu.dot_dimension_numbers<[1], [0], [0], [1], [0, 0, 1, 1], [], []>} : vector<32x128xbf16>, vector<128x384xbf16>, vector<32x384xf32> -> vector<32x384xf32>
    %c0_3 = arith.constant 0 : index
    %c0_4 = arith.constant 0 : index
    %4 = vector.load %arg4[%c0_3, %c0_4] : memref<1x384xf32, #tpu.memory_space<vmem>>, vector<1x384xf32>
    %5 = vector.broadcast %4 : vector<1x384xf32> to vector<32x384xf32>
    %6 = arith.addf %3, %5 : vector<32x384xf32>
    %cst_5 = arith.constant 5.000000e-01 : f32
    %7 = vector.broadcast %cst_5 : f32 to vector<32x384xf32>
    %8 = arith.mulf %7, %6 : vector<32x384xf32>
    %cst_6 = arith.constant 5.000000e-01 : f32
    %9 = vector.broadcast %cst_6 : f32 to vector<32x384xf32>
    %10 = arith.mulf %9, %6 : vector<32x384xf32>
    %11 = math.tanh %10 : vector<32x384xf32>
    %cst_7 = arith.constant 1.000000e+00 : f32
    %12 = vector.broadcast %cst_7 : f32 to vector<32x384xf32>
    %13 = arith.addf %12, %11 : vector<32x384xf32>
    %14 = arith.mulf %8, %13 : vector<32x384xf32>
    %15 = arith.truncf %14 : vector<32x384xf32> to vector<32x384xbf16>
    %c0_8 = arith.constant 0 : index
    %c0_9 = arith.constant 0 : index
    %16 = vector.load %arg5[%c0_8, %c0_9] : memref<384x128xbf16, #tpu.memory_space<vmem>>, vector<384x128xbf16>
    %cst_10 = arith.constant dense<0.000000e+00> : vector<32x128xf32>
    %17 = tpu.matmul %15, %16, %cst_10 {dimension_numbers = #tpu.dot_dimension_numbers<[1], [0], [0], [1], [0, 0, 1, 1], [], []>} : vector<32x384xbf16>, vector<384x128xbf16>, vector<32x128xf32> -> vector<32x128xf32>
    %c0_11 = arith.constant 0 : index
    %c0_12 = arith.constant 0 : index
    %18 = vector.load %arg6[%c0_11, %c0_12] : memref<1x128xf32, #tpu.memory_space<vmem>>, vector<1x128xf32>
    %19 = vector.broadcast %18 : vector<1x128xf32> to vector<32x128xf32>
    %20 = arith.addf %17, %19 : vector<32x128xf32>
    %c0_13 = arith.constant 0 : index
    %c0_14 = arith.constant 0 : index
    %21 = vector.load %arg2[%c0_13, %c0_14] : memref<32x1xf32, #tpu.memory_space<vmem>>, vector<32x1xf32>
    %c0_15 = arith.constant 0 : index
    %c0_16 = arith.constant 0 : index
    %22 = vector.load %arg7[%c0_15, %c0_16] : memref<1x128xf32, #tpu.memory_space<vmem>>, vector<1x128xf32>
    %23 = vector.broadcast %22 : vector<1x128xf32> to vector<32x128xf32>
    %24 = arith.mulf %23, %20 : vector<32x128xf32>
    %25 = vector.broadcast %21 : vector<32x1xf32> to vector<32x128xf32>
    %26 = arith.addf %25, %24 : vector<32x128xf32>
    %c0_17 = arith.constant 0 : index
    %c0_18 = arith.constant 0 : index
    %27 = vector.load %arg8[%c0_17, %c0_18] : memref<32x128xf32, #tpu.memory_space<vmem>>, vector<32x128xf32>
    tpu.vector_store %arg8[%c0_17, %c0_18], %26 {strides = array<i32>} : memref<32x128xf32, #tpu.memory_space<vmem>>, vector<32x128xf32>,
    return
  }
  func.func @transform_0(%arg0: i32) -> (i32, i32) {
    %c0_i32 = arith.constant 0 : i32
    %c0_i32_0 = arith.constant 0 : i32
    return %arg0, %c0_i32 : i32, i32
  }
  func.func @transform_1(%arg0: i32) -> (i32, i32) {
    %c0_i32 = arith.constant 0 : i32
    %c0_i32_0 = arith.constant 0 : i32
    return %arg0, %c0_i32 : i32, i32
  }
  func.func @transform_2(%arg0: i32) -> (i32, i32) {
    %c0_i32 = arith.constant 0 : i32
    %c0_i32_0 = arith.constant 0 : i32
    %c0_i32_1 = arith.constant 0 : i32
    return %c0_i32, %c0_i32_0 : i32, i32
  }
  func.func @transform_3(%arg0: i32) -> (i32, i32) {
    %c0_i32 = arith.constant 0 : i32
    %c0_i32_0 = arith.constant 0 : i32
    %c0_i32_1 = arith.constant 0 : i32
    return %c0_i32, %c0_i32_0 : i32, i32
  }
  func.func @transform_4(%arg0: i32) -> (i32, i32) {
    %c0_i32 = arith.constant 0 : i32
    %c0_i32_0 = arith.constant 0 : i32
    %c0_i32_1 = arith.constant 0 : i32
    return %c0_i32, %c0_i32_0 : i32, i32
  }
  func.func @transform_5(%arg0: i32) -> (i32, i32) {
    %c0_i32 = arith.constant 0 : i32
    %c0_i32_0 = arith.constant 0 : i32
    %c0_i32_1 = arith.constant 0 : i32
    return %c0_i32, %c0_i32_0 : i32, i32
  }
  func.func @transform_6(%arg0: i32) -> (i32, i32) {
    %c0_i32 = arith.constant 0 : i32
    %c0_i32_0 = arith.constant 0 : i32
    %c0_i32_1 = arith.constant 0 : i32
    return %c0_i32, %c0_i32_0 : i32, i32
  }
  func.func @transform_7(%arg0: i32) -> (i32, i32) {
    %c0_i32 = arith.constant 0 : i32
    %c0_i32_0 = arith.constant 0 : i32
    return %arg0, %c0_i32 : i32, i32
  }
}

</mosaic_0001>

<bundles_post_ra>
// kernel: sub.16
= control target key start
LH: loop header
LB: loop body
LE: loop exit
PB: predicated region body
PF: predicated region fallthrough
CT: control target
= control target key end

     0   :  { %s34_s0 = inlined_call_operand.vmem [shape: f32[256], index: 0, kind: input, shape index: {}]   ;;  %s35_s1 = inlined_call_operand.vmem [shape: f32[256], index: 1, kind: input, shape index: {}]   ;;  %s36_s2 = inlined_call_operand.vmem [shape: f32[256], index: 2, kind: output, shape index: {}]  }
   0x1   :  { %v3_v0 = vld [vmem:[%s34_s0] sm:$0x3] }
   0x2   :  { %v4_v1 = vld [vmem:[%s35_s1] sm:$0x3] }
   0x3   :  { %v7_v2 = vsub.f32 %v3_v0, %v4_v1 }
   0x5   :  { %9 = vst [vmem:[%s36_s2] sm:$0x3] %v7_v2 }

// kernel: mp_pde_forward.20
= control target key start
LH: loop header
LB: loop body
LE: loop exit
PB: predicated region body
PF: predicated region fallthrough
CT: control target
= control target key end

     0   :  { %s675_s18 = smov 0   ;;  %s735_s0 = inlined_call_operand.vmem [shape: f32[64,27], index: 0, kind: input, shape index: {}]   ;;  %s736_s1 = inlined_call_operand.vmem [shape: bf16[27,128], index: 1, kind: input, shape index: {}]   ;;  %s737_s2 = inlined_call_operand.vmem [shape: f32[1,128], index: 2, kind: input, shape index: {}]   ;;  %s738_s3 = inlined_call_operand.vmem [shape: bf16[128,128], index: 3, kind: input, shape index: {}]   ;;  %s739_s4 = inlined_call_operand.vmem [shape: f32[1,128], index: 4, kind: input, shape index: {}]   ;;  %s740_s5 = inlined_call_operand.vmem [shape: f32[64,128], index: 5, kind: output, shape index: {}]  }
   0x1 LB: > { %s534_s19 = sadd.s32 4294967295, %s642_s18   ;;  %p538_p0 = scmp.ge.s32.totalorder %s642_s18, 1  ;;  %s642_s18 = sphi %s675_s18, %s15_s18  }
   0x2   : > { %p188_p1 = scmp.lt.s32.totalorder %s642_s18, 3 }
   0x4   : > { %p189_p2 = pnand %p538_p0, %p188_p1 }
   0x5   : > { %v610_v0 = vld [vmem:[%s736_s1] sm:$0xff] (!%p189_p2)   ;;  %vm264_vm0 = vcmask (!%p189_p2), 1044480   ;;  %v611_v1 = vld [vmem:[%s736_s1 + $0x8] sm:$0x3f] (!%p189_p2)   ;;  %vm265_vm1 = vcmask (!%p189_p2), 1045504   ;;  %s539_s24 = sshll.u32 (!%p189_p2), %s534_s19, 2 }
   0x6   : > { %192 = sbr.rel (%p189_p2) target bundleno = 492 (0x1ec), region = 40  ;;  %573 = vmatprep.subr.bf16.mxu0 (!%p189_p2), %v610_v0  ;;  %v644_v2 = vmov (!%p189_p2), 65535   ;;  %p217_p3 = scmp.lt.s32.totalorder (!%p189_p2), %s539_s24, 7  ;;  %v612_v4 = vld [vmem:[%s738_s3] sm:$0xff] (!%p189_p2)   ;;  %v613_v5 = vld [vmem:[%s738_s3 + $0x8] sm:$0xff] (!%p189_p2)   ;;  %vm257_vm2 = vcmask (!%p189_p2), 220160  }
   0x7   : > { %574 = vmatpush3.bf16.msra.mxu0 (!%p189_p2), %v610_v0  ;;  %v266_v3 = vsel (!%p189_p2), %vm264_vm0, 4294967295, %v644_v2  ;;  %581 = vmatprep.subr.bf16.mxu1 (!%p189_p2), %v612_v4  ;;  %v614_v14 = vld [vmem:[%s738_s3 + $0x10] sm:$0xff] (!%p189_p2)   ;;  %v615_v15 = vld [vmem:[%s738_s3 + $0x18] sm:$0xff] (!%p189_p2)   ;;  %v616_v16 = vld [vmem:[%s738_s3 + $0x20] sm:$0xff] (!%p189_p2)  }
   0x8   : > { %v267_v6 = vsel (!%p189_p2), %vm265_vm1, %v266_v3, 0  ;;  %582 = vmatpush3.bf16.msra.mxu1 (!%p189_p2), %v612_v4  ;;  %v617_v17 = vld [vmem:[%s738_s3 + $0x28] sm:$0xff] (!%p189_p2)   ;;  %v618_v18 = vld [vmem:[%s738_s3 + $0x30] sm:$0xff] (!%p189_p2)   ;;  %v619_v19 = vld [vmem:[%s738_s3 + $0x38] sm:$0xff] (!%p189_p2)  }
   0x9   : > { %v269_v7 = vand.u32 (!%p189_p2), %v611_v1, %v267_v6  ;;  %583 = vmatprep.subr.bf16.mxu1 (!%p189_p2), %v613_v5  ;;  %v543_v20 = vld [vmem:[%s737_s2] ss:$0 sm:$0xff] (!%p189_p2) }
   0xa   : > { %v548_v47 = vld [vmem:[%s739_s4] ss:$0 sm:$0xff] (!%p189_p2) }
   0xb   : > { %575 = vmatprep.subr.bf16.mxu0 (!%p189_p2), %v269_v7 }
   0xc   : > { %576 = vmatpush3.bf16.msra.mxu0 (!%p189_p2), %v269_v7  ;;  %584 = vmatpush3.bf16.msra.mxu1 (!%p189_p2), %v613_v5 }
   0xd   : > { %s742_s24 = smov (!%p217_p3, %s539_s24), 7  ;;  %585 = vmatprep.subr.bf16.mxu1 %v614_v14 }
   0xe   : > { %s540_s29 = sshll.u32 %s742_s24, 3 }
   0xf   : > { %s220_s7 = scalar_lea.vmem %s735_s0, %s540_s29  ;;  %s226_s28 = scalar_lea.vmem %s740_s5, %s540_s29 }
  0x10   : > { %v229_v8 = vld [vmem:[%s220_s7] sm:$0xff]  ;;  %v230_v9 = vld [vmem:[%s220_s7 + $0x8] sm:$0xff]  ;;  %v231_v10 = vld [vmem:[%s220_s7 + $0x10] sm:$0xff]  ;;  %586 = vmatpush3.bf16.msra.mxu1 %v614_v14 }
  0x11   : > { %v233_v11 = vpack.c.bf16 %v230_v9, %v229_v8  ;;  %v232_v12 = vld [vmem:[%s220_s7 + $0x18] sm:$0xff]  ;;  %587 = vmatprep.subr.bf16.mxu1 %v615_v15 }
  0x12   : > { %v234_v13 = vpack.c.bf16 %v232_v12, %v231_v10 }
  0x13   : > { %577 = vmatprep.mubr.msk.bf16.mxu0 %vm257_vm2, %v233_v11 }
  0x14   : > { %578 = vmatmul.mubr.msk.bf16.vlgmr.msra.gmra.mrb[0].mxu0 %vm257_vm2, %v234_v13  ;;  %588 = vmatpush3.bf16.msra.mxu1 %v615_v15 }
  0x15   : > { %589 = vmatprep.subr.bf16.mxu1 %v616_v16 }
  0x18   : > { %590 = vmatpush3.bf16.msra.mxu1 %v616_v16 }
  0x19   : > { %591 = vmatprep.subr.bf16.mxu1 %v617_v17 }
  0x1c   : > { %592 = vmatpush3.bf16.msra.mxu1 %v617_v17 }
  0x1d   : > { %593 = vmatprep.subr.bf16.mxu1 %v618_v18 }
  0x20   : > { %594 = vmatpush3.bf16.msra.mxu1 %v618_v18 }
  0x21   : > { %595 = vmatprep.subr.bf16.mxu1 %v619_v19 }
  0x24   : > { %596 = vmatpush3.bf16.msra.mxu1 %v619_v19 }
  0xe7   : > { %v579_v21 = vpop.f32.mrb[0].mxu0 }
  0xe8   : > { %v314_v22 = vadd.f32 %v579_v21, %v543_v20  ;;  %v305_v23 = vpop.f32.mrb[1].mxu0 }
  0xe9   : > { %v306_v24 = vadd.f32 %v543_v20, %v305_v23  ;;  %v580_v25 = vpop.f32.mrb[2].mxu0 }
  0xea   : > { %v322_v26 = vmul.f32 0.5, %v314_v22  ;;  %v317_v27 = vadd.f32 %v580_v25, %v543_v20  ;;  %v308_v28 = vpop.f32.mrb[3].mxu0 }
  0xeb   : > { %v320_v29 = vmul.f32 0.5, %v306_v24  ;;  %v309_v30 = vadd.f32 %v543_v20, %v308_v28 }
  0xec   : > { %620 = vtanh.f32 %v322_v26  ;;  %v323_v31 = vmul.f32 0.5, %v317_v27 }
  0xed   : > { %622 = vtanh.f32 %v320_v29  ;;  %v321_v32 = vmul.f32 0.5, %v309_v30 }
  0xee   : > { %624 = vtanh.f32 %v323_v31 }
  0xef   : > { %626 = vtanh.f32 %v321_v32 }
  0xf6   : > { %v621_v33 = vpop.eup %620 }
  0xf7   : > { %v623_v34 = vpop.eup %622  ;;  %v330_v35 = vadd.f32 1.0, %v621_v33 }
  0xf8   : > { %v625_v36 = vpop.eup %624  ;;  %v328_v37 = vadd.f32 1.0, %v623_v34 }
  0xf9   : > { %v627_v38 = vpop.eup %626  ;;  %v331_v39 = vadd.f32 1.0, %v625_v36  ;;  %v334_v41 = vmul.f32 %v330_v35, %v322_v26 }
  0xfa   : > { %v329_v40 = vadd.f32 1.0, %v627_v38  ;;  %v332_v43 = vmul.f32 %v328_v37, %v320_v29 }
  0xfb   : > { %v335_v42 = vmul.f32 %v331_v39, %v323_v31 }
  0xfc   : > { %v333_v44 = vmul.f32 %v329_v40, %v321_v32 }
  0xfd   : > { %v337_v45 = vpack.c.bf16 %v335_v42, %v334_v41 }
  0xfe   : > { %v336_v46 = vpack.c.bf16 %v333_v44, %v332_v43 }
 0x100   : > { %597 = vmatprep.mubr.bf16.mxu1 %v336_v46 }
 0x101   : > { %598 = vmatmul.mubr.bf16.vlgmr.msra.gmra.mrb[0].mxu1 %v337_v45 }
 0x1d4   : > { %v599_v48 = vpop.f32.mrb[0].mxu1 }
 0x1d5   : > { %v452_v49 = vadd.f32 %v599_v48, %v548_v47  ;;  %v443_v50 = vpop.f32.mrb[1].mxu1 }
 0x1d6   : > { %v444_v51 = vadd.f32 %v548_v47, %v443_v50  ;;  %v600_v52 = vpop.f32.mrb[2].mxu1 }
 0x1d7   : > { %v460_v53 = vmul.f32 0.5, %v452_v49  ;;  %v455_v54 = vadd.f32 %v600_v52, %v548_v47  ;;  %v446_v55 = vpop.f32.mrb[3].mxu1 }
 0x1d8   : > { %v458_v56 = vmul.f32 0.5, %v444_v51  ;;  %v447_v57 = vadd.f32 %v548_v47, %v446_v55 }
 0x1d9   : > { %628 = vtanh.f32 %v460_v53  ;;  %v461_v58 = vmul.f32 0.5, %v455_v54 }
 0x1da   : > { %630 = vtanh.f32 %v458_v56  ;;  %v459_v59 = vmul.f32 0.5, %v447_v57 }
 0x1db   : > { %632 = vtanh.f32 %v461_v58 }
 0x1dc   : > { %634 = vtanh.f32 %v459_v59 }
 0x1e3   : > { %v629_v60 = vpop.eup %628 }
 0x1e4   : > { %v631_v61 = vpop.eup %630  ;;  %v468_v1 = vadd.f32 1.0, %v629_v60 }
 0x1e5   : > { %v633_v62 = vpop.eup %632  ;;  %v466_v63 = vadd.f32 1.0, %v631_v61 }
 0x1e6   : > { %v635_v0 = vpop.eup %634  ;;  %v469_v3 = vadd.f32 1.0, %v633_v62  ;;  %v472_v6 = vmul.f32 %v468_v1, %v460_v53 }
 0x1e7   : > { %v470_v2 = vmul.f32 %v466_v63, %v458_v56  ;;  %v467_v4 = vadd.f32 1.0, %v635_v0 }
 0x1e8   : > { %v473_v7 = vmul.f32 %v469_v3, %v461_v58  ;;  %476 = vst [vmem:[%s226_s28 + $0x10] sm:$0xff] %v472_v6 }
 0x1e9   : > { %474 = vst [vmem:[%s226_s28] sm:$0xff] %v470_v2  ;;  %v471_v5 = vmul.f32 %v467_v4, %v459_v59 }
 0x1ea   : > { %477 = vst [vmem:[%s226_s28 + $0x18] sm:$0xff] %v473_v7 }
 0x1eb   : > { %475 = vst [vmem:[%s226_s28 + $0x8] sm:$0xff] %v471_v5 }
 0x1ec PF: > { %s15_s18 = sadd.s32 1, %s642_s18  }
 0x1ed   : > { %p12_p4 = scmp.ge.s32.totalorder %s15_s18, 4  }
 0x1ef   :  { %14 = sbr.rel (!%p12_p4) target bundleno = 1 (0x1), region = 70 }

// kernel: sub.8
= control target key start
LH: loop header
LB: loop body
LE: loop exit
PB: predicated region body
PF: predicated region fallthrough
CT: control target
= control target key end

     0   :  { %s716_s0 = inlined_call_operand.vmem [shape: f32[256,25], index: 0, kind: input, shape index: {}]   ;;  %s717_s1 = inlined_call_operand.vmem [shape: f32[256,25], index: 1, kind: input, shape index: {}]   ;;  %s718_s2 = inlined_call_operand.vmem [shape: f32[256,25], index: 2, kind: output, shape index: {}]  }
   0x1   :  { %v3_v0 = vld [vmem:[%s716_s0] sm:$0xff]  ;;  %v320_v2 = vld [vmem:[%s716_s0 + $0x8] sm:$0xff]  ;;  %v323_v5 = vld [vmem:[%s716_s0 + $0x10] sm:$0xff] }
   0x2   :  { %v4_v1 = vld [vmem:[%s717_s1] sm:$0xff]  ;;  %v321_v4 = vld [vmem:[%s717_s1 + $0x8] sm:$0xff]  ;;  %v324_v6 = vld [vmem:[%s717_s1 + $0x10] sm:$0xff] }
   0x3   :  { %v7_v3 = vsub.f32 %v3_v0, %v4_v1  ;;  %v16_v7 = vsub.f32 %v320_v2, %v321_v4  ;;  %v26_v8 = vsub.f32 %v323_v5, %v324_v6  ;;  %v326_v9 = vld [vmem:[%s716_s0 + $0x18] sm:$0xff]  ;;  %v329_v11 = vld [vmem:[%s716_s0 + $0x20] sm:$0xff]  ;;  %v332_v14 = vld [vmem:[%s716_s0 + $0x28] sm:$0xff] }
   0x4   :  { %v327_v10 = vld [vmem:[%s717_s1 + $0x18] sm:$0xff]  ;;  %v330_v13 = vld [vmem:[%s717_s1 + $0x20] sm:$0xff]  ;;  %v333_v15 = vld [vmem:[%s717_s1 + $0x28] sm:$0xff] }
   0x5   :  { %9 = vst [vmem:[%s718_s2] sm:$0xff] %v7_v3  ;;  %v36_v12 = vsub.f32 %v326_v9, %v327_v10  ;;  %322 = vst [vmem:[%s718_s2 + $0x8] sm:$0xff] %v16_v7  ;;  %v46_v16 = vsub.f32 %v329_v11, %v330_v13  ;;  %v56_v17 = vsub.f32 %v332_v14, %v333_v15  ;;  %v335_v18 = vld [vmem:[%s716_s0 + $0x30] sm:$0xff]  ;;  %v338_v20 = vld [vmem:[%s716_s0 + $0x38] sm:$0xff] }
   0x6   :  { %325 = vst [vmem:[%s718_s2 + $0x10] sm:$0xff] %v26_v8  ;;  %v336_v19 = vld [vmem:[%s717_s1 + $0x30] sm:$0xff]  ;;  %v339_v22 = vld [vmem:[%s717_s1 + $0x38] sm:$0xff]  ;;  %v341_v23 = vld [vmem:[%s716_s0 + $0x40] sm:$0xff] }
   0x7   :  { %328 = vst [vmem:[%s718_s2 + $0x18] sm:$0xff] %v36_v12  ;;  %v66_v21 = vsub.f32 %v335_v18, %v336_v19  ;;  %v342_v24 = vld [vmem:[%s717_s1 + $0x40] sm:$0xff]  ;;  %331 = vst [vmem:[%s718_s2 + $0x20] sm:$0xff] %v46_v16  ;;  %v76_v25 = vsub.f32 %v338_v20, %v339_v22  ;;  %v344_v27 = vld [vmem:[%s716_s0 + $0x48] sm:$0xff] }
   0x8   :  { %334 = vst [vmem:[%s718_s2 + $0x28] sm:$0xff] %v56_v17  ;;  %v86_v26 = vsub.f32 %v341_v23, %v342_v24  ;;  %v345_v28 = vld [vmem:[%s717_s1 + $0x48] sm:$0xff]  ;;  %v347_v29 = vld [vmem:[%s716_s0 + $0x50] sm:$0xff]  ;;  %v350_v32 = vld [vmem:[%s716_s0 + $0x58] sm:$0xff] }
   0x9   :  { %337 = vst [vmem:[%s718_s2 + $0x30] sm:$0xff] %v66_v21  ;;  %v96_v30 = vsub.f32 %v344_v27, %v345_v28  ;;  %v348_v31 = vld [vmem:[%s717_s1 + $0x50] sm:$0xff]  ;;  %v351_v33 = vld [vmem:[%s717_s1 + $0x58] sm:$0xff]  ;;  %340 = vst [vmem:[%s718_s2 + $0x38] sm:$0xff] %v76_v25 }
   0xa   :  { %343 = vst [vmem:[%s718_s2 + $0x40] sm:$0xff] %v86_v26  ;;  %v106_v34 = vsub.f32 %v347_v29, %v348_v31  ;;  %v116_v35 = vsub.f32 %v350_v32, %v351_v33  ;;  %v353_v36 = vld [vmem:[%s716_s0 + $0x60] sm:$0xff]  ;;  %v356_v38 = vld [vmem:[%s716_s0 + $0x68] sm:$0xff]  ;;  %v359_v41 = vld [vmem:[%s716_s0 + $0x70] sm:$0xff] }
   0xb   :  { %v354_v37 = vld [vmem:[%s717_s1 + $0x60] sm:$0xff]  ;;  %346 = vst [vmem:[%s718_s2 + $0x48] sm:$0xff] %v96_v30  ;;  %v357_v40 = vld [vmem:[%s717_s1 + $0x68] sm:$0xff]  ;;  %v360_v42 = vld [vmem:[%s717_s1 + $0x70] sm:$0xff] }
   0xc   :  { %v126_v39 = vsub.f32 %v353_v36, %v354_v37  ;;  %349 = vst [vmem:[%s718_s2 + $0x50] sm:$0xff] %v106_v34  ;;  %352 = vst [vmem:[%s718_s2 + $0x58] sm:$0xff] %v116_v35  ;;  %v136_v43 = vsub.f32 %v356_v38, %v357_v40  ;;  %v146_v44 = vsub.f32 %v359_v41, %v360_v42  ;;  %v362_v45 = vld [vmem:[%s716_s0 + $0x78] sm:$0xff]  ;;  %v365_v47 = vld [vmem:[%s716_s0 + $0x80] sm:$0xff] }
   0xd   :  { %v363_v46 = vld [vmem:[%s717_s1 + $0x78] sm:$0xff]  ;;  %v366_v49 = vld [vmem:[%s717_s1 + $0x80] sm:$0xff]  ;;  %v368_v50 = vld [vmem:[%s716_s0 + $0x88] sm:$0xff] }
   0xe   :  { %355 = vst [vmem:[%s718_s2 + $0x60] sm:$0xff] %v126_v39  ;;  %v156_v48 = vsub.f32 %v362_v45, %v363_v46  ;;  %v369_v51 = vld [vmem:[%s717_s1 + $0x88] sm:$0xff]  ;;  %358 = vst [vmem:[%s718_s2 + $0x68] sm:$0xff] %v136_v43  ;;  %v166_v52 = vsub.f32 %v365_v47, %v366_v49  ;;  %v371_v54 = vld [vmem:[%s716_s0 + $0x90] sm:$0xff] }
   0xf   :  { %361 = vst [vmem:[%s718_s2 + $0x70] sm:$0xff] %v146_v44  ;;  %v176_v53 = vsub.f32 %v368_v50, %v369_v51  ;;  %v372_v55 = vld [vmem:[%s717_s1 + $0x90] sm:$0xff]  ;;  %v374_v56 = vld [vmem:[%s716_s0 + $0x98] sm:$0xff]  ;;  %v377_v59 = vld [vmem:[%s716_s0 + $0xa0] sm:$0xff] }
  0x10   :  { %364 = vst [vmem:[%s718_s2 + $0x78] sm:$0xff] %v156_v48  ;;  %v186_v57 = vsub.f32 %v371_v54, %v372_v55  ;;  %v375_v58 = vld [vmem:[%s717_s1 + $0x98] sm:$0xff]  ;;  %v378_v60 = vld [vmem:[%s717_s1 + $0xa0] sm:$0xff]  ;;  %367 = vst [vmem:[%s718_s2 + $0x80] sm:$0xff] %v166_v52 }
  0x11   :  { %370 = vst [vmem:[%s718_s2 + $0x88] sm:$0xff] %v176_v53  ;;  %v196_v61 = vsub.f32 %v374_v56, %v375_v58  ;;  %v206_v62 = vsub.f32 %v377_v59, %v378_v60  ;;  %v380_v63 = vld [vmem:[%s716_s0 + $0xa8] sm:$0xff]  ;;  %v383_v1 = vld [vmem:[%s716_s0 + $0xb0] sm:$0xff]  ;;  %v386_v4 = vld [vmem:[%s716_s0 + $0xb8] sm:$0xff] }
  0x12   :  { %v381_v0 = vld [vmem:[%s717_s1 + $0xa8] sm:$0xff]  ;;  %373 = vst [vmem:[%s718_s2 + $0x90] sm:$0xff] %v186_v57  ;;  %v384_v3 = vld [vmem:[%s717_s1 + $0xb0] sm:$0xff]  ;;  %v387_v5 = vld [vmem:[%s717_s1 + $0xb8] sm:$0xff] }
  0x13   :  { %v216_v2 = vsub.f32 %v380_v63, %v381_v0  ;;  %376 = vst [vmem:[%s718_s2 + $0x98] sm:$0xff] %v196_v61  ;;  %379 = vst [vmem:[%s718_s2 + $0xa0] sm:$0xff] %v206_v62  ;;  %v226_v6 = vsub.f32 %v383_v1, %v384_v3  ;;  %v236_v7 = vsub.f32 %v386_v4, %v387_v5  ;;  %v389_v8 = vld [vmem:[%s716_s0 + $0xc0] sm:$0xff]  ;;  %v392_v10 = vld [vmem:[%s716_s0 + $0xc8] sm:$0xff] }
  0x14   :  { %v390_v9 = vld [vmem:[%s717_s1 + $0xc0] sm:$0xff]  ;;  %v393_v12 = vld [vmem:[%s717_s1 + $0xc8] sm:$0xff]  ;;  %v395_v13 = vld [vmem:[%s716_s0 + $0xd0] sm:$0xff] }
  0x15   :  { %382 = vst [vmem:[%s718_s2 + $0xa8] sm:$0xff] %v216_v2  ;;  %v246_v11 = vsub.f32 %v389_v8, %v390_v9  ;;  %v396_v14 = vld [vmem:[%s717_s1 + $0xd0] sm:$0xff]  ;;  %385 = vst [vmem:[%s718_s2 + $0xb0] sm:$0xff] %v226_v6  ;;  %v256_v15 = vsub.f32 %v392_v10, %v393_v12  ;;  %v398_v17 = vld [vmem:[%s716_s0 + $0xd8] sm:$0xff] }
  0x16   :  { %388 = vst [vmem:[%s718_s2 + $0xb8] sm:$0xff] %v236_v7  ;;  %v266_v16 = vsub.f32 %v395_v13, %v396_v14  ;;  %v399_v18 = vld [vmem:[%s717_s1 + $0xd8] sm:$0xff]  ;;  %v401_v19 = vld [vmem:[%s716_s0 + $0xe0] sm:$0xff]  ;;  %v404_v22 = vld [vmem:[%s716_s0 + $0xe8] sm:$0xff] }
  0x17   :  { %391 = vst [vmem:[%s718_s2 + $0xc0] sm:$0xff] %v246_v11  ;;  %v276_v20 = vsub.f32 %v398_v17, %v399_v18  ;;  %v402_v21 = vld [vmem:[%s717_s1 + $0xe0] sm:$0xff]  ;;  %v405_v23 = vld [vmem:[%s717_s1 + $0xe8] sm:$0xff]  ;;  %394 = vst [vmem:[%s718_s2 + $0xc8] sm:$0xff] %v256_v15 }
  0x18   :  { %397 = vst [vmem:[%s718_s2 + $0xd0] sm:$0xff] %v266_v16  ;;  %v286_v24 = vsub.f32 %v401_v19, %v402_v21  ;;  %v296_v25 = vsub.f32 %v404_v22, %v405_v23  ;;  %v407_v26 = vld [vmem:[%s716_s0 + $0xf0] sm:$0xff]  ;;  %v410_v28 = vld [vmem:[%s716_s0 + $0xf8] sm:$0xff] }
  0x19   :  { %v408_v27 = vld [vmem:[%s717_s1 + $0xf0] sm:$0xff]  ;;  %400 = vst [vmem:[%s718_s2 + $0xd8] sm:$0xff] %v276_v20  ;;  %v411_v30 = vld [vmem:[%s717_s1 + $0xf8] sm:$0xff] }
  0x1a   :  { %v306_v29 = vsub.f32 %v407_v26, %v408_v27  ;;  %403 = vst [vmem:[%s718_s2 + $0xe0] sm:$0xff] %v286_v24  ;;  %406 = vst [vmem:[%s718_s2 + $0xe8] sm:$0xff] %v296_v25  ;;  %v316_v31 = vsub.f32 %v410_v28, %v411_v30 }
  0x1c   :  { %409 = vst [vmem:[%s718_s2 + $0xf0] sm:$0xff] %v306_v29  ;;  %412 = vst [vmem:[%s718_s2 + $0xf8] sm:$0xff] %v316_v31 }

// kernel: mp_pde_forward.21
= control target key start
LH: loop header
LB: loop body
LE: loop exit
PB: predicated region body
PF: predicated region fallthrough
CT: control target
= control target key end

     0   :  { %s473_s9 = smov 0   ;;  %s542_s0 = inlined_call_operand.vmem [shape: f32[64,128], index: 0, kind: input, shape index: {}]   ;;  %s543_s1 = inlined_call_operand.vmem [shape: bf16[128,256], index: 1, kind: input, shape index: {}]   ;;  %s544_s2 = inlined_call_operand.vmem [shape: f32[64,256], index: 2, kind: output, shape index: {}]  }
   0x1 LB: > { %s371_s10 = sadd.s32 4294967295, %s455_s9   ;;  %p375_p0 = scmp.ge.s32.totalorder %s455_s9, 1  ;;  %s455_s9 = sphi %s473_s9, %s12_s9  }
   0x2   : > { %p113_p1 = scmp.lt.s32.totalorder %s455_s9, 3 }
   0x4   : > { %p114_p2 = pnand %p375_p0, %p113_p1 }
   0x5   : > { %v425_v0 = vld [vmem:[%s543_s1 + $0x4] ss:$8 sps:$4 sm:$0xff] (!%p114_p2)   ;;  %v427_v1 = vld [vmem:[%s543_s1] ss:$8 sps:$4 sm:$0xff] (!%p114_p2)   ;;  %v457_v2 = vmov (!%p114_p2), 0   ;;  %s376_s25 = sshll.u32 (!%p114_p2), %s371_s10, 2 }
   0x6   : > { %117 = sbr.rel (%p114_p2) target bundleno = 255 (0xff), region = 28  ;;  %284 = vmatprep.mubr.bf16.mxu0 (!%p114_p2), %v457_v2  ;;  %294 = vmatprep.mubr.bf16.mxu1 (!%p114_p2), %v457_v2  ;;  %v428_v3 = vld [vmem:[%s543_s1 + $0x14] ss:$8 sps:$4 sm:$0xff] (!%p114_p2)   ;;  %v430_v4 = vld [vmem:[%s543_s1 + $0x10] ss:$8 sps:$4 sm:$0xff] (!%p114_p2)   ;;  %p137_p3 = scmp.lt.s32.totalorder (!%p114_p2), %s376_s25, 7 }
   0x7   : > { %252 = vmatprep.subr.bf16.mxu0 (!%p114_p2), %v425_v0  ;;  %400 = vmatprep.subr.bf16.mxu1 (!%p114_p2), %v425_v0  ;;  %v431_v5 = vld [vmem:[%s543_s1 + $0x24] ss:$8 sps:$4 sm:$0xff] (!%p114_p2)   ;;  %v433_v6 = vld [vmem:[%s543_s1 + $0x20] ss:$8 sps:$4 sm:$0xff] (!%p114_p2)   ;;  %v434_v7 = vld [vmem:[%s543_s1 + $0x34] ss:$8 sps:$4 sm:$0xff] (!%p114_p2)  }
   0x8   : > { %253 = vmatpush1.bf16.msra.mxu0 (!%p114_p2), %v427_v1  ;;  %408 = vmatpush1.bf16.msra.mxu1 (!%p114_p2), %v427_v1  ;;  %v436_v8 = vld [vmem:[%s543_s1 + $0x30] ss:$8 sps:$4 sm:$0xff] (!%p114_p2)   ;;  %v437_v9 = vld [vmem:[%s543_s1 + $0x44] ss:$8 sps:$4 sm:$0xff] (!%p114_p2)   ;;  %v439_v10 = vld [vmem:[%s543_s1 + $0x40] ss:$8 sps:$4 sm:$0xff] (!%p114_p2)  }
   0x9   : > { %254 = vmatprep.subr.bf16.mxu0 (!%p114_p2), %v428_v3  ;;  %401 = vmatprep.subr.bf16.mxu1 (!%p114_p2), %v428_v3  ;;  %v440_v11 = vld [vmem:[%s543_s1 + $0x54] ss:$8 sps:$4 sm:$0xff] (!%p114_p2)   ;;  %v442_v12 = vld [vmem:[%s543_s1 + $0x50] ss:$8 sps:$4 sm:$0xff] (!%p114_p2)   ;;  %v443_v13 = vld [vmem:[%s543_s1 + $0x64] ss:$8 sps:$4 sm:$0xff] (!%p114_p2)  }
   0xa   : > { %v445_v14 = vld [vmem:[%s543_s1 + $0x60] ss:$8 sps:$4 sm:$0xff] (!%p114_p2)   ;;  %v446_v15 = vld [vmem:[%s543_s1 + $0x74] ss:$8 sps:$4 sm:$0xff] (!%p114_p2)   ;;  %v448_v16 = vld [vmem:[%s543_s1 + $0x70] ss:$8 sps:$4 sm:$0xff] (!%p114_p2)  }
   0xc   : > { %255 = vmatpush1.bf16.msra.mxu0 (!%p114_p2), %v430_v4  ;;  %409 = vmatpush1.bf16.msra.mxu1 (!%p114_p2), %v430_v4 }
   0xd   : > { %256 = vmatprep.subr.bf16.mxu0 %v431_v5  ;;  %402 = vmatprep.subr.bf16.mxu1 %v431_v5  ;;  %s546_s25 = smov (!%p137_p3, %s376_s25), 7 }
   0xe   : > { %s377_s11 = sshll.u32 %s546_s25, 3  ;;  %s399_s21 = sshll.u32 %s546_s25, 4 }
   0xf   : > { %s140_s16 = scalar_lea.vmem %s542_s0, %s377_s11  ;;  %s147_s24 = scalar_lea.vmem %s544_s2, %s399_s21 }
  0x10   : > { %257 = vmatpush1.bf16.msra.mxu0 %v433_v6  ;;  %410 = vmatpush1.bf16.msra.mxu1 %v433_v6  ;;  %v150_v17 = vld [vmem:[%s140_s16] sm:$0xff]  ;;  %v151_v18 = vld [vmem:[%s140_s16 + $0x8] sm:$0xff]  ;;  %v152_v19 = vld [vmem:[%s140_s16 + $0x10] sm:$0xff] }
  0x11   : > { %258 = vmatprep.subr.bf16.mxu0 %v434_v7  ;;  %403 = vmatprep.subr.bf16.mxu1 %v434_v7  ;;  %v153_v20 = vld [vmem:[%s140_s16 + $0x18] sm:$0xff]  ;;  %v154_v21 = vpack.c.bf16 %v151_v18, %v150_v17 }
  0x12   : > { %v155_v22 = vpack.c.bf16 %v153_v20, %v152_v19 }
  0x14   : > { %259 = vmatpush1.bf16.msra.mxu0 %v436_v8  ;;  %411 = vmatpush1.bf16.msra.mxu1 %v436_v8 }
  0x15   : > { %260 = vmatprep.subr.bf16.mxu0 %v437_v9  ;;  %404 = vmatprep.subr.bf16.mxu1 %v437_v9 }
  0x18   : > { %261 = vmatpush1.bf16.msra.mxu0 %v439_v10  ;;  %412 = vmatpush1.bf16.msra.mxu1 %v439_v10 }
  0x19   : > { %262 = vmatprep.subr.bf16.mxu0 %v440_v11  ;;  %405 = vmatprep.subr.bf16.mxu1 %v440_v11 }
  0x1c   : > { %263 = vmatpush1.bf16.msra.mxu0 %v442_v12  ;;  %413 = vmatpush1.bf16.msra.mxu1 %v442_v12 }
  0x1d   : > { %264 = vmatprep.subr.bf16.mxu0 %v443_v13  ;;  %406 = vmatprep.subr.bf16.mxu1 %v443_v13 }
  0x20   : > { %265 = vmatpush1.bf16.msra.mxu0 %v445_v14  ;;  %414 = vmatpush1.bf16.msra.mxu1 %v445_v14 }
  0x21   : > { %266 = vmatprep.subr.bf16.mxu0 %v446_v15  ;;  %407 = vmatprep.subr.bf16.mxu1 %v446_v15 }
  0x24   : > { %267 = vmatpush1.bf16.msra.mxu0 %v448_v16  ;;  %415 = vmatpush1.bf16.msra.mxu1 %v448_v16 }
  0x27   : > { %285 = vmatmul.mubr.bf16.vlgmr.msra.gmra.mrb[0].mxu0 %v154_v21  ;;  %295 = vmatmul.mubr.bf16.vlgmr.msra.gmra.mrb[0].mxu1 %v155_v22 }
  0xfa   : > { %v286_v23 = vpop.f32.mrb[0].mxu0  ;;  %v296_v24 = vpop.f32.mrb[0].mxu1 }
  0xfb   : > { %305 = vst [vmem:[%s147_s24] sm:$0xff] %v286_v23  ;;  %v288_v25 = vpop.f32.mrb[1].mxu0  ;;  %v298_v26 = vpop.f32.mrb[1].mxu1  ;;  %309 = vst [vmem:[%s147_s24 + $0x20] sm:$0xff] %v296_v24 }
  0xfc   : > { %306 = vst [vmem:[%s147_s24 + $0x8] sm:$0xff] %v288_v25  ;;  %v290_v27 = vpop.f32.mrb[2].mxu0  ;;  %v300_v28 = vpop.f32.mrb[2].mxu1  ;;  %310 = vst [vmem:[%s147_s24 + $0x28] sm:$0xff] %v298_v26 }
  0xfd   : > { %307 = vst [vmem:[%s147_s24 + $0x10] sm:$0xff] %v290_v27  ;;  %v292_v29 = vpop.f32.mrb[3].mxu0  ;;  %v302_v30 = vpop.f32.mrb[3].mxu1  ;;  %311 = vst [vmem:[%s147_s24 + $0x30] sm:$0xff] %v300_v28 }
  0xfe   : > { %308 = vst [vmem:[%s147_s24 + $0x18] sm:$0xff] %v292_v29  ;;  %312 = vst [vmem:[%s147_s24 + $0x38] sm:$0xff] %v302_v30 }
  0xff PF: > { %s12_s9 = sadd.s32 1, %s455_s9  }
 0x100   : > { %p9_p4 = scmp.ge.s32.totalorder %s12_s9, 4  }
 0x102   :  { %11 = sbr.rel (!%p9_p4) target bundleno = 1 (0x1), region = 58 }

// kernel: mp_pde_forward.22
= control target key start
LH: loop header
LB: loop body
LE: loop exit
PB: predicated region body
PF: predicated region fallthrough
CT: control target
= control target key end

     0   :  { %s1427_s27 = smov 0   ;;  %s1692_s0 = inlined_call_operand.vmem [shape: f32[256,128], index: 0, kind: input, shape index: {}]   ;;  %s1693_s1 = inlined_call_operand.vmem [shape: f32[256,128], index: 1, kind: input, shape index: {}]   ;;  %s1694_s2 = inlined_call_operand.vmem [shape: f32[256,27], index: 2, kind: input, shape index: {}]   ;;  %s1695_s3 = inlined_call_operand.vmem [shape: f32[256,1], index: 3, kind: input, shape index: {}]   ;;  %s1696_s4 = inlined_call_operand.vmem [shape: bf16[27,128], index: 4, kind: input, shape index: {}]   ;;  %s1697_s5 = inlined_call_operand.vmem [shape: f32[1,128], index: 5, kind: input, shape index: {}]   ;;  %s1698_s6 = inlined_call_operand.vmem [shape: bf16[128,128], index: 6, kind: input, shape index: {}]   ;;  %s1699_s7 = inlined_call_operand.vmem [shape: f32[1,128], index: 7, kind: input, shape index: {}]   ;;  %s1700_s8 = inlined_call_operand.vmem [shape: f32[256,128], index: 8, kind: output, shape index: {}]  }
   0x1 LB: > { %s1155_s28 = sadd.s32 4294967295, %s1378_s27   ;;  %p1159_p0 = scmp.ge.s32.totalorder %s1378_s27, 1  ;;  %s1378_s27 = sphi %s1427_s27, %s18_s27  }
   0x2   : > { %p296_p1 = scmp.lt.s32.totalorder %s1378_s27, 3 }
   0x4   : > { %p297_p2 = pnand %p1159_p0, %p296_p1 }
   0x5   : > { %v1298_v0 = vld [vmem:[%s1696_s4] sm:$0xff] (!%p297_p2)   ;;  %vm488_vm0 = vcmask (!%p297_p2), 1044480   ;;  %v1299_v1 = vld [vmem:[%s1696_s4 + $0x8] sm:$0x3f] (!%p297_p2)   ;;  %vm489_vm1 = vcmask (!%p297_p2), 1045504   ;;  %s1160_s11 = sshll.u32 (!%p297_p2), %s1155_s28, 4 }
   0x6   : > { %300 = sbr.rel (%p297_p2) target bundleno = 520 (0x208), region = 52  ;;  %1218 = vmatprep.subr.bf16.mxu0 (!%p297_p2), %v1298_v0  ;;  %v1380_v2 = vmov (!%p297_p2), 65535   ;;  %p346_p3 = scmp.lt.s32.totalorder (!%p297_p2), %s1160_s11, 31  ;;  %v1300_v4 = vld [vmem:[%s1698_s6] sm:$0xff] (!%p297_p2)   ;;  %vm463_vm2 = vcmask (!%p297_p2), 220160   ;;  %v1301_v31 = vld [vmem:[%s1698_s6 + $0x8] sm:$0xff] (!%p297_p2)  }
   0x7   : > { %1219 = vmatpush3.bf16.msra.mxu0 (!%p297_p2), %v1298_v0  ;;  %v490_v3 = vsel (!%p297_p2), %vm488_vm0, 4294967295, %v1380_v2  ;;  %1270 = vmatprep.subr.bf16.mxu1 (!%p297_p2), %v1300_v4  ;;  %v1302_v32 = vld [vmem:[%s1698_s6 + $0x10] sm:$0xff] (!%p297_p2)   ;;  %v1303_v33 = vld [vmem:[%s1698_s6 + $0x18] sm:$0xff] (!%p297_p2)   ;;  %v1304_v34 = vld [vmem:[%s1698_s6 + $0x20] sm:$0xff] (!%p297_p2)   ;;  %v1381_v38 = vmov (!%p297_p2), 0  }
   0x8   : > { %v491_v5 = vsel (!%p297_p2), %vm489_vm1, %v490_v3, 0  ;;  %1278 = vmatpush3.bf16.msra.mxu1 (!%p297_p2), %v1300_v4  ;;  %v1305_v35 = vld [vmem:[%s1698_s6 + $0x28] sm:$0xff] (!%p297_p2)   ;;  %v1306_v36 = vld [vmem:[%s1698_s6 + $0x30] sm:$0xff] (!%p297_p2)   ;;  %v1307_v37 = vld [vmem:[%s1698_s6 + $0x38] sm:$0xff] (!%p297_p2)   ;;  %1297 = vset.pattern.permute.xlu1 (!%p297_p2), %v1381_v38 }
   0x9   : > { %v493_v6 = vand.u32 (!%p297_p2), %v1299_v1, %v491_v5  ;;  %1271 = vmatprep.subr.bf16.mxu1 (!%p297_p2), %v1301_v31  ;;  %1296 = vset.pattern.permute.xlu0 (!%p297_p2), %v1381_v38  ;;  %v1542_v3 = vld [vmem:[%s1697_s5] ss:$0 sm:$0xff] (!%p297_p2) }
   0xb   : > { %1220 = vmatprep.subr.bf16.mxu0 (!%p297_p2), %v493_v6 }
   0xc   : > { %1221 = vmatpush3.bf16.msra.mxu0 (!%p297_p2), %v493_v6  ;;  %1279 = vmatpush3.bf16.msra.mxu1 (!%p297_p2), %v1301_v31 }
   0xd   : > { %s1702_s11 = smov (!%p346_p3, %s1160_s11), 31  ;;  %1238 = vmatprep.subr.bf16.mxu0 %v1300_v4  ;;  %1272 = vmatprep.subr.bf16.mxu1 %v1302_v32 }
   0xe   : > { %s1444_s14 = sshll.u32 %s1702_s11, 3 }
   0xf   : > { %s1450_s17 = scalar_lea.vmem %s1694_s2, %s1444_s14  ;;  %s1501_s13 = scalar_lea.vmem %s1695_s3, %s1444_s14 }
  0x10   : > { %v424_v7 = vld [vmem:[%s1450_s17] sm:$0xff]  ;;  %v425_v8 = vld [vmem:[%s1450_s17 + $0x8] sm:$0xff]  ;;  %v426_v9 = vld [vmem:[%s1450_s17 + $0x10] sm:$0xff]  ;;  %1280 = vmatpush3.bf16.msra.mxu1 %v1302_v32  ;;  %s1529_s20 = scalar_lea.vmem %s1693_s1, %s1444_s14  ;;  %s1652_s28 = scalar_lea.vmem %s1700_s8, %s1444_s14 }
  0x11   : > { %v440_v10 = vpack.c.bf16 %v425_v8, %v424_v7  ;;  %v427_v11 = vld [vmem:[%s1450_s17 + $0x18] sm:$0xff]  ;;  %v428_v12 = vld [vmem:[%s1450_s17 + $0x20] sm:$0xff]  ;;  %v429_v13 = vld [vmem:[%s1450_s17 + $0x28] sm:$0xff]  ;;  %1273 = vmatprep.subr.bf16.mxu1 %v1303_v33 }
  0x12   : > { %v441_v14 = vpack.c.bf16 %v427_v11, %v426_v9  ;;  %v442_v15 = vpack.c.bf16 %v429_v13, %v428_v12  ;;  %v430_v16 = vld [vmem:[%s1450_s17 + $0x30] sm:$0xff]  ;;  %v431_v17 = vld [vmem:[%s1450_s17 + $0x38] sm:$0xff]  ;;  %v432_v18 = vld [vmem:[%s1450_s17 + $0x40] sm:$0xff] }
  0x13   : > { %1222 = vmatprep.mubr.msk.bf16.mxu0 %vm463_vm2, %v440_v10  ;;  %v433_v19 = vld [vmem:[%s1450_s17 + $0x48] sm:$0xff]  ;;  %v443_v20 = vpack.c.bf16 %v431_v17, %v430_v16  ;;  %v434_v22 = vld [vmem:[%s1450_s17 + $0x50] sm:$0xff]  ;;  %v435_v23 = vld [vmem:[%s1450_s17 + $0x58] sm:$0xff] }
  0x14   : > { %1223 = vmatmul.mubr.msk.bf16.vlgmr.msra.gmra.mrb[0].mxu0 %vm463_vm2, %v441_v14  ;;  %v444_v21 = vpack.c.bf16 %v433_v19, %v432_v18  ;;  %v436_v24 = vld [vmem:[%s1450_s17 + $0x60] sm:$0xff]  ;;  %v437_v25 = vld [vmem:[%s1450_s17 + $0x68] sm:$0xff]  ;;  %v445_v26 = vpack.c.bf16 %v435_v23, %v434_v22  ;;  %v438_v28 = vld [vmem:[%s1450_s17 + $0x70] sm:$0xff]  ;;  %1281 = vmatpush3.bf16.msra.mxu1 %v1303_v33 }
  0x15   : > { %1226 = vmatprep.mubr.msk.bf16.mxu0 %vm463_vm2, %v442_v15  ;;  %1239 = vmatpush3.bf16.msra.mxu0 %v1300_v4  ;;  %v446_v27 = vpack.c.bf16 %v437_v25, %v436_v24  ;;  %v439_v29 = vld [vmem:[%s1450_s17 + $0x78] sm:$0xff]  ;;  %v937_v39 = vld [vmem:[%s1501_s13 + $0x10] sm:$0xff]  ;;  %v935_v40 = vld [vmem:[%s1501_s13] sm:$0xff]  ;;  %s1523_s17 = scalar_lea.vmem %s1692_s0, %s1444_s14 }
  0x16   : > { %v447_v30 = vpack.c.bf16 %v439_v29, %v438_v28  ;;  %1240 = vmatprep.subr.bf16.mxu0 %v1301_v31  ;;  %1274 = vmatprep.subr.bf16.mxu1 %v1304_v34  ;;  %v938_v41 = vld [vmem:[%s1501_s13 + $0x18] sm:$0xff]  ;;  %v936_v42 = vld [vmem:[%s1501_s13 + $0x8] sm:$0xff]  ;;  %v939_v44 = vld [vmem:[%s1501_s13 + $0x20] sm:$0xff] }
  0x17   : > { %963 = vperm.xlu1 %1297, %v937_v39   ;;  %953 = vperm.xlu0 %1296, %v935_v40   ;;  %v940_v43 = vld [vmem:[%s1501_s13 + $0x28] sm:$0xff]  ;;  %v942_v45 = vld [vmem:[%s1501_s13 + $0x38] sm:$0xff]  ;;  %v941_v46 = vld [vmem:[%s1501_s13 + $0x30] sm:$0xff] }
  0x18   : > { %1282 = vmatpush3.bf16.msra.mxu1 %v1304_v34  ;;  %v944_v47 = vld [vmem:[%s1501_s13 + $0x48] sm:$0xff]  ;;  %v943_v48 = vld [vmem:[%s1501_s13 + $0x40] sm:$0xff]  ;;  %v946_v49 = vld [vmem:[%s1501_s13 + $0x58] sm:$0xff] }
  0x19   : > { %1241 = vmatpush3.bf16.msra.mxu0 %v1301_v31  ;;  %1275 = vmatprep.subr.bf16.mxu1 %v1305_v35  ;;  %v945_v50 = vld [vmem:[%s1501_s13 + $0x50] sm:$0xff]  ;;  %v948_v51 = vld [vmem:[%s1501_s13 + $0x68] sm:$0xff]  ;;  %v947_v52 = vld [vmem:[%s1501_s13 + $0x60] sm:$0xff] }
  0x1a   : > { %1242 = vmatprep.subr.bf16.mxu0 %v1302_v32  ;;  %v950_v53 = vld [vmem:[%s1501_s13 + $0x78] sm:$0xff]  ;;  %v949_v54 = vld [vmem:[%s1501_s13 + $0x70] sm:$0xff]  ;;  %v376_v57 = vld [vmem:[%s1523_s17] sm:$0xff] }
  0x1b   : > { %968 = vperm.xlu1 %1297, %v938_v41   ;;  %958 = vperm.xlu0 %1296, %v936_v42   ;;  %v378_v55 = vld [vmem:[%s1523_s17 + $0x10] sm:$0xff]  ;;  %v392_v58 = vld [vmem:[%s1529_s20] sm:$0xff]  ;;  %v379_v59 = vld [vmem:[%s1523_s17 + $0x18] sm:$0xff] }
  0x1c   : > { %1227 = vmatmul.mubr.msk.bf16.gmra.mrb[4].mxu0 %vm463_vm2, %v443_v20  ;;  %1283 = vmatpush3.bf16.msra.mxu1 %v1305_v35  ;;  %v394_v56 = vld [vmem:[%s1529_s20 + $0x10] sm:$0xff]  ;;  %v395_v60 = vld [vmem:[%s1529_s20 + $0x18] sm:$0xff]  ;;  %v377_v62 = vld [vmem:[%s1523_s17 + $0x8] sm:$0xff]  ;;  %v408_v0 = vadd.f32 %v392_v58, %v376_v57 }
  0x1d   : > { %1230 = vmatprep.mubr.msk.bf16.mxu0 %vm463_vm2, %v444_v21  ;;  %1243 = vmatpush3.bf16.msra.mxu0 %v1302_v32  ;;  %v410_v61 = vadd.f32 %v394_v56, %v378_v55  ;;  %v393_v63 = vld [vmem:[%s1529_s20 + $0x8] sm:$0xff]  ;;  %v411_v1 = vadd.f32 %v395_v60, %v379_v59  ;;  %v382_v9 = vld [vmem:[%s1523_s17 + $0x30] sm:$0xff]  ;;  %v380_v14 = vld [vmem:[%s1523_s17 + $0x20] sm:$0xff] }
  0x1e   : > { %1244 = vmatprep.subr.bf16.mxu0 %v1303_v33  ;;  %1276 = vmatprep.subr.bf16.mxu1 %v1306_v36  ;;  %v409_v4 = vadd.f32 %v393_v63, %v377_v62  ;;  %v398_v10 = vld [vmem:[%s1529_s20 + $0x30] sm:$0xff]  ;;  %v396_v15 = vld [vmem:[%s1529_s20 + $0x20] sm:$0xff]  ;;  %v383_v18 = vld [vmem:[%s1523_s17 + $0x38] sm:$0xff] }
  0x1f   : > { %978 = vperm.xlu1 %1297, %v940_v43   ;;  %973 = vperm.xlu0 %1296, %v939_v44   ;;  %v399_v19 = vld [vmem:[%s1529_s20 + $0x38] sm:$0xff]  ;;  %v414_v22 = vadd.f32 %v398_v10, %v382_v9  ;;  %v381_v23 = vld [vmem:[%s1523_s17 + $0x28] sm:$0xff]  ;;  %v402_v38 = vld [vmem:[%s1529_s20 + $0x50] sm:$0xff] }
  0x20   : > { %1284 = vmatpush3.bf16.msra.mxu1 %v1306_v36  ;;  %v397_v24 = vld [vmem:[%s1529_s20 + $0x28] sm:$0xff]  ;;  %v415_v29 = vadd.f32 %v399_v19, %v383_v18  ;;  %v384_v42 = vld [vmem:[%s1523_s17 + $0x40] sm:$0xff]  ;;  %v406_v62 = vld [vmem:[%s1529_s20 + $0x70] sm:$0xff] }
  0x21   : > { %1245 = vmatpush3.bf16.msra.mxu0 %v1303_v33  ;;  %1277 = vmatprep.subr.bf16.mxu1 %v1307_v37  ;;  %v413_v32 = vadd.f32 %v397_v24, %v381_v23  ;;  %v400_v43 = vld [vmem:[%s1529_s20 + $0x40] sm:$0xff]  ;;  %v391_v9 = vld [vmem:[%s1523_s17 + $0x78] sm:$0xff] }
  0x22   : > { %1246 = vmatprep.subr.bf16.mxu0 %v1304_v34  ;;  %v416_v55 = vadd.f32 %v400_v43, %v384_v42  ;;  %v407_v10 = vld [vmem:[%s1529_s20 + $0x78] sm:$0xff] }
  0x23   : > { %988 = vperm.xlu1 %1297, %v942_v45   ;;  %983 = vperm.xlu0 %1296, %v941_v46   ;;  %v387_v46 = vld [vmem:[%s1523_s17 + $0x58] sm:$0xff] }
  0x24   : > { %1231 = vmatmul.mubr.msk.bf16.gmra.mrb[8].mxu0 %vm463_vm2, %v445_v26  ;;  %1285 = vmatpush3.bf16.msra.mxu1 %v1307_v37 }
  0x25   : > { %1234 = vmatprep.mubr.msk.bf16.mxu0 %vm463_vm2, %v446_v27  ;;  %1247 = vmatpush3.bf16.msra.mxu0 %v1304_v34  ;;  %v412_v27 = vadd.f32 %v396_v15, %v380_v14 }
  0x26   : > { %1248 = vmatprep.subr.bf16.mxu0 %v1305_v35 }
  0x27   : > { %998 = vperm.xlu1 %1297, %v944_v47   ;;  %993 = vperm.xlu0 %1296, %v943_v48   ;;  %v403_v47 = vld [vmem:[%s1529_s20 + $0x58] sm:$0xff] }
  0x28   : > { %v419_v57 = vadd.f32 %v403_v47, %v387_v46 }
  0x29   : > { %1249 = vmatpush3.bf16.msra.mxu0 %v1305_v35 }
  0x2a   : > { %1250 = vmatprep.subr.bf16.mxu0 %v1306_v36 }
  0x2b   : > { %1008 = vperm.xlu1 %1297, %v946_v49   ;;  %1003 = vperm.xlu0 %1296, %v945_v50  }
  0x2c   : > { %1235 = vmatmul.mubr.msk.bf16.gmra.mrb[12].mxu0 %vm463_vm2, %v447_v30 }
  0x2d   : > { %1251 = vmatpush3.bf16.msra.mxu0 %v1306_v36 }
  0x2e   : > { %1252 = vmatprep.subr.bf16.mxu0 %v1307_v37 }
  0x2f   : > { %1018 = vperm.xlu1 %1297, %v948_v51   ;;  %1013 = vperm.xlu0 %1296, %v947_v52   ;;  %v385_v51 = vld [vmem:[%s1523_s17 + $0x48] sm:$0xff] }
  0x30   : > { %v401_v52 = vld [vmem:[%s1529_s20 + $0x48] sm:$0xff] }
  0x31   : > { %1253 = vmatpush3.bf16.msra.mxu0 %v1307_v37  ;;  %v386_v37 = vld [vmem:[%s1523_s17 + $0x50] sm:$0xff]  ;;  %v417_v60 = vadd.f32 %v401_v52, %v385_v51 }
  0x32   : > { %v418_v50 = vadd.f32 %v402_v38, %v386_v37 }
  0x33   : > { %1028 = vperm.xlu1 %1297, %v950_v53   ;;  %1023 = vperm.xlu0 %1296, %v949_v54  }
  0xe7   : > { %v1224_v2 = vpop.f32.mrb[0].mxu0 }
  0xe8   : > { %v594_v5 = vadd.f32 %v1224_v2, %v410_v61  ;;  %v529_v6 = vpop.f32.mrb[1].mxu0  ;;  %v390_v61 = vld [vmem:[%s1523_s17 + $0x70] sm:$0xff]  ;;  %v388_v2 = vld [vmem:[%s1523_s17 + $0x60] sm:$0xff] }
  0xe9   : > { %v592_v7 = vadd.f32 %v529_v6, %v408_v0  ;;  %v1225_v8 = vpop.f32.mrb[2].mxu0 }
  0xea   : > { %v617_v11 = vadd.f32 %v1542_v3, %v594_v5  ;;  %v595_v12 = vadd.f32 %v1225_v8, %v411_v1  ;;  %v532_v13 = vpop.f32.mrb[3].mxu0 }
  0xeb   : > { %v615_v16 = vadd.f32 %v1542_v3, %v592_v7  ;;  %v593_v17 = vadd.f32 %v532_v13, %v409_v4  ;;  %v404_v4 = vld [vmem:[%s1529_s20 + $0x60] sm:$0xff] }
  0xec   : > { %v1552_v20 = vmul.f32 0.5, %v617_v11  ;;  %v618_v21 = vadd.f32 %v1542_v3, %v595_v12 }
  0xed   : > { %v1557_v25 = vmul.f32 0.5, %v615_v16  ;;  %v616_v26 = vadd.f32 %v1542_v3, %v593_v17  ;;  %v422_v16 = vadd.f32 %v406_v62, %v390_v61 }
  0xee   : > { %1308 = vtanh.f32 %v1552_v20  ;;  %v1561_v28 = vmul.f32 0.5, %v618_v21 }
  0xef   : > { %1310 = vtanh.f32 %v1557_v25  ;;  %v1564_v30 = vmul.f32 0.5, %v616_v26  ;;  %v1228_v31 = vpop.f32.mrb[4].mxu0 }
  0xf0   : > { %1312 = vtanh.f32 %v1561_v28  ;;  %v598_v33 = vadd.f32 %v1228_v31, %v414_v22  ;;  %v545_v34 = vpop.f32.mrb[5].mxu0  ;;  %v420_v22 = vadd.f32 %v404_v4, %v388_v2  ;;  %v405_v31 = vld [vmem:[%s1529_s20 + $0x68] sm:$0xff] }
  0xf1   : > { %1314 = vtanh.f32 %v1564_v30  ;;  %v596_v35 = vadd.f32 %v545_v34, %v412_v27  ;;  %v1229_v36 = vpop.f32.mrb[6].mxu0  ;;  %v423_v27 = vadd.f32 %v407_v10, %v391_v9 }
  0xf2   : > { %v621_v39 = vadd.f32 %v1542_v3, %v598_v33  ;;  %v599_v40 = vadd.f32 %v1229_v36, %v415_v29  ;;  %v548_v41 = vpop.f32.mrb[7].mxu0  ;;  %v389_v29 = vld [vmem:[%s1523_s17 + $0x68] sm:$0xff] }
  0xf3   : > { %v619_v44 = vadd.f32 %v1542_v3, %v596_v35  ;;  %v597_v45 = vadd.f32 %v548_v41, %v413_v32  ;;  %v421_v42 = vadd.f32 %v405_v31, %v389_v29 }
  0xf4   : > { %v1576_v48 = vmul.f32 0.5, %v621_v39  ;;  %v622_v49 = vadd.f32 %v1542_v3, %v599_v40 }
  0xf5   : > { %v1581_v53 = vmul.f32 0.5, %v619_v44  ;;  %v620_v54 = vadd.f32 %v1542_v3, %v597_v45 }
  0xf6   : > { %1316 = vtanh.f32 %v1576_v48  ;;  %v1585_v56 = vmul.f32 0.5, %v622_v49 }
  0xf7   : > { %1318 = vtanh.f32 %v1581_v53  ;;  %v1588_v58 = vmul.f32 0.5, %v620_v54  ;;  %v1232_v59 = vpop.f32.mrb[8].mxu0 }
  0xf8   : > { %v1309_v63 = vpop.eup %1308  ;;  %1320 = vtanh.f32 %v1585_v56  ;;  %v602_v0 = vadd.f32 %v1232_v59, %v418_v50  ;;  %v561_v1 = vpop.f32.mrb[9].mxu0 }
  0xf9   : > { %v1311_v5 = vpop.eup %1310  ;;  %v665_v6 = vadd.f32 1.0, %v1309_v63  ;;  %1322 = vtanh.f32 %v1588_v58  ;;  %v600_v7 = vadd.f32 %v561_v1, %v416_v55  ;;  %v1233_v8 = vpop.f32.mrb[10].mxu0 }
  0xfa   : > { %v1313_v11 = vpop.eup %1312  ;;  %v663_v12 = vadd.f32 1.0, %v1311_v5  ;;  %v625_v13 = vadd.f32 %v1542_v3, %v602_v0  ;;  %v603_v14 = vadd.f32 %v1233_v8, %v419_v57  ;;  %v564_v15 = vpop.f32.mrb[11].mxu0 }
  0xfb   : > { %v1315_v17 = vpop.eup %1314  ;;  %v666_v18 = vadd.f32 1.0, %v1313_v11  ;;  %v623_v19 = vadd.f32 %v1542_v3, %v600_v7  ;;  %v601_v21 = vadd.f32 %v564_v15, %v417_v60  ;;  %v681_v32 = vmul.f32 %v665_v6, %v1552_v20 }
  0xfc   : > { %v664_v23 = vadd.f32 1.0, %v1315_v17  ;;  %v1600_v24 = vmul.f32 0.5, %v625_v13  ;;  %v626_v26 = vadd.f32 %v1542_v3, %v603_v14  ;;  %v679_v36 = vmul.f32 %v663_v12, %v1557_v25 }
  0xfd   : > { %v682_v33 = vmul.f32 %v666_v18, %v1561_v28  ;;  %v639_v34 = vmul.f32 0.5, %v623_v19  ;;  %v624_v35 = vadd.f32 %v1542_v3, %v601_v21 }
  0xfe   : > { %v680_v37 = vmul.f32 %v664_v23, %v1564_v30  ;;  %1324 = vtanh.f32 %v1600_v24  ;;  %v642_v38 = vmul.f32 0.5, %v626_v26 }
  0xff   : > { %v696_v39 = vpack.c.bf16 %v682_v33, %v681_v32  ;;  %1326 = vtanh.f32 %v639_v34  ;;  %v640_v40 = vmul.f32 0.5, %v624_v35  ;;  %v1236_v41 = vpop.f32.mrb[12].mxu0 }
 0x100   : > { %v1317_v43 = vpop.eup %1316  ;;  %1328 = vtanh.f32 %v642_v38  ;;  %v606_v20 = vadd.f32 %v1236_v41, %v422_v16  ;;  %v577_v44 = vpop.f32.mrb[13].mxu0  ;;  %v695_v28 = vpack.c.bf16 %v680_v37, %v679_v36 }
 0x101   : > { %v1319_v45 = vpop.eup %1318  ;;  %v669_v46 = vadd.f32 1.0, %v1317_v43  ;;  %1330 = vtanh.f32 %v640_v40  ;;  %v604_v47 = vadd.f32 %v577_v44, %v420_v22  ;;  %v1237_v25 = vpop.f32.mrb[14].mxu0 }
 0x102   : > { %v1321_v49 = vpop.eup %1320  ;;  %v629_v30 = vadd.f32 %v1542_v3, %v606_v20  ;;  %v607_v50 = vadd.f32 %v1237_v25, %v423_v27  ;;  %v580_v51 = vpop.f32.mrb[15].mxu0  ;;  %1254 = vmatprep.mubr.bf16.mxu0 %v695_v28  ;;  %v667_v52 = vadd.f32 1.0, %v1319_v45 }
 0x103   : > { %v1323_v54 = vpop.eup %1322  ;;  %v670_v55 = vadd.f32 1.0, %v1321_v49  ;;  %v627_v57 = vadd.f32 %v1542_v3, %v604_v47  ;;  %v605_v59 = vadd.f32 %v580_v51, %v421_v42  ;;  %1255 = vmatmul.mubr.bf16.vlgmr.msra.gmra.mrb[16].mxu0 %v696_v39  ;;  %v685_v63 = vmul.f32 %v669_v46, %v1576_v48  ;;  %v954_v39 = vpop.permute.xlu0 %953 }
 0x104   : > { %v645_v60 = vmul.f32 0.5, %v629_v30  ;;  %v630_v61 = vadd.f32 %v1542_v3, %v607_v50  ;;  %v668_v62 = vadd.f32 1.0, %v1323_v54  ;;  %v683_v5 = vmul.f32 %v667_v52, %v1581_v53  ;;  %v964_v20 = vpop.permute.xlu1 %963 }
 0x105   : > { %v686_v0 = vmul.f32 %v670_v55, %v1585_v56  ;;  %v643_v1 = vmul.f32 0.5, %v627_v57  ;;  %v628_v2 = vadd.f32 %v1542_v3, %v605_v59 }
 0x106   : > { %1332 = vtanh.f32 %v645_v60  ;;  %v646_v4 = vmul.f32 0.5, %v630_v61  ;;  %v684_v6 = vmul.f32 %v668_v62, %v1588_v58 }
 0x107   : > { %1334 = vtanh.f32 %v643_v1  ;;  %v644_v7 = vmul.f32 0.5, %v628_v2  ;;  %v698_v8 = vpack.c.bf16 %v686_v0, %v685_v63  ;;  %v959_v30 = vpop.permute.xlu0 %958 }
 0x108   : > { %v1325_v9 = vpop.eup %1324  ;;  %1336 = vtanh.f32 %v646_v4  ;;  %v697_v10 = vpack.c.bf16 %v684_v6, %v683_v5  ;;  %v969_v51 = vpop.permute.xlu1 %968 }
 0x109   : > { %v1327_v11 = vpop.eup %1326  ;;  %v673_v12 = vadd.f32 1.0, %v1325_v9  ;;  %1338 = vtanh.f32 %v644_v7 }
 0x10a   : > { %v1329_v48 = vpop.eup %1328  ;;  %v671_v56 = vadd.f32 1.0, %v1327_v11  ;;  %1258 = vmatprep.mubr.bf16.mxu1 %v697_v10 }
 0x10b   : > { %v1331_v13 = vpop.eup %1330  ;;  %v674_v3 = vadd.f32 1.0, %v1329_v48  ;;  %1259 = vmatmul.mubr.bf16.vlgmr.msra.gmra.mrb[0].mxu1 %v698_v8  ;;  %v689_v53 = vmul.f32 %v673_v12, %v1600_v24  ;;  %v1635_v0 = vpop.permute.xlu0 %973 }
 0x10c   : > { %v672_v14 = vadd.f32 1.0, %v1331_v13  ;;  %v687_v58 = vmul.f32 %v671_v56, %v639_v34  ;;  %v1623_v34 = vld [vmem:[%s1699_s7] ss:$0 sm:$0xff]  ;;  %v1642_v5 = vpop.permute.xlu1 %978 }
 0x10d   : > { %v690_v15 = vmul.f32 %v674_v3, %v642_v38 }
 0x10e   : > { %v688_v16 = vmul.f32 %v672_v14, %v640_v40 }
 0x10f   : > { %v700_v17 = vpack.c.bf16 %v690_v15, %v689_v53  ;;  %v984_v15 = vpop.permute.xlu0 %983 }
 0x110   : > { %v1333_v18 = vpop.eup %1332  ;;  %v699_v19 = vpack.c.bf16 %v688_v16, %v687_v58 }
 0x111   : > { %v1335_v21 = vpop.eup %1334  ;;  %v677_v22 = vadd.f32 1.0, %v1333_v18 }
 0x112   : > { %v1337_v23 = vpop.eup %1336  ;;  %v675_v26 = vadd.f32 1.0, %v1335_v21  ;;  %1262 = vmatprep.mubr.bf16.mxu1 %v699_v19 }
 0x113   : > { %v1339_v27 = vpop.eup %1338  ;;  %v678_v29 = vadd.f32 1.0, %v1337_v23  ;;  %1263 = vmatmul.mubr.bf16.gmra.mrb[4].mxu1 %v700_v17  ;;  %v693_v32 = vmul.f32 %v677_v22, %v645_v60 }
 0x114   : > { %v676_v31 = vadd.f32 1.0, %v1339_v27  ;;  %v691_v35 = vmul.f32 %v675_v26, %v643_v1  ;;  %v989_v27 = vpop.permute.xlu1 %988 }
 0x115   : > { %v694_v33 = vmul.f32 %v678_v29, %v646_v4 }
 0x116   : > { %v692_v36 = vmul.f32 %v676_v31, %v644_v7 }
 0x117   : > { %v702_v24 = vpack.c.bf16 %v694_v33, %v693_v32 }
 0x118   : > { %v701_v37 = vpack.c.bf16 %v692_v36, %v691_v35 }
 0x11a   : > { %1266 = vmatprep.mubr.bf16.mxu1 %v701_v37 }
 0x11b   : > { %1267 = vmatmul.mubr.bf16.gmra.mrb[8].mxu1 %v702_v24 }
 0x1d6   : > { %v1256_v38 = vpop.f32.mrb[16].mxu0 }
 0x1d7   : > { %v817_v40 = vadd.f32 %v1256_v38, %v1623_v34  ;;  %v808_v41 = vpop.f32.mrb[17].mxu0 }
 0x1d8   : > { %v809_v42 = vadd.f32 %v1623_v34, %v808_v41  ;;  %v1257_v43 = vpop.f32.mrb[18].mxu0 }
 0x1d9   : > { %v873_v44 = vmul.f32 0.5, %v817_v40  ;;  %v820_v28 = vadd.f32 %v1257_v43, %v1623_v34  ;;  %v811_v45 = vpop.f32.mrb[19].mxu0  ;;  %v994_v40 = vpop.permute.xlu0 %993 }
 0x1da   : > { %v871_v46 = vmul.f32 0.5, %v809_v42  ;;  %v812_v47 = vadd.f32 %v1623_v34, %v811_v45 }
 0x1db   : > { %1340 = vtanh.f32 %v873_v44  ;;  %v874_v25 = vmul.f32 0.5, %v820_v28 }
 0x1dc   : > { %1342 = vtanh.f32 %v871_v46  ;;  %v872_v49 = vmul.f32 0.5, %v812_v47  ;;  %v999_v47 = vpop.permute.xlu1 %998 }
 0x1dd   : > { %1344 = vtanh.f32 %v874_v25 }
 0x1de   : > { %1346 = vtanh.f32 %v872_v49  ;;  %v1260_v50 = vpop.f32.mrb[0].mxu1 }
 0x1df   : > { %v833_v52 = vadd.f32 %v1260_v50, %v1623_v34  ;;  %v824_v54 = vpop.f32.mrb[1].mxu1 }
 0x1e0   : > { %v825_v55 = vadd.f32 %v1623_v34, %v824_v54  ;;  %v1261_v57 = vpop.f32.mrb[2].mxu1 }
 0x1e1   : > { %v877_v59 = vmul.f32 0.5, %v833_v52  ;;  %v836_v60 = vadd.f32 %v1261_v57, %v1623_v34  ;;  %v827_v61 = vpop.f32.mrb[3].mxu1 }
 0x1e2   : > { %v1632_v62 = vmul.f32 0.5, %v825_v55  ;;  %v828_v63 = vadd.f32 %v1623_v34, %v827_v61 }
 0x1e3   : > { %1348 = vtanh.f32 %v877_v59  ;;  %v1637_v1 = vmul.f32 0.5, %v836_v60 }
 0x1e4   : > { %1350 = vtanh.f32 %v1632_v62  ;;  %v1640_v2 = vmul.f32 0.5, %v828_v63 }
 0x1e5   : > { %v1341_v4 = vpop.eup %1340  ;;  %1352 = vtanh.f32 %v1637_v1 }
 0x1e6   : > { %v1343_v6 = vpop.eup %1342  ;;  %v905_v7 = vadd.f32 1.0, %v1341_v4  ;;  %1354 = vtanh.f32 %v1640_v2  ;;  %v1264_v8 = vpop.f32.mrb[4].mxu1 }
 0x1e7   : > { %v1345_v9 = vpop.eup %1344  ;;  %v903_v10 = vadd.f32 1.0, %v1343_v6  ;;  %v849_v11 = vadd.f32 %v1264_v8, %v1623_v34  ;;  %v840_v12 = vpop.f32.mrb[5].mxu1 }
 0x1e8   : > { %v1347_v48 = vpop.eup %1346  ;;  %v921_v56 = vmul.f32 %v905_v7, %v873_v44  ;;  %v906_v13 = vadd.f32 1.0, %v1345_v9  ;;  %v841_v3 = vadd.f32 %v1623_v34, %v840_v12  ;;  %v1265_v14 = vpop.f32.mrb[6].mxu1 }
 0x1e9   : > { %v919_v53 = vmul.f32 %v903_v10, %v871_v46  ;;  %v904_v58 = vadd.f32 1.0, %v1347_v48  ;;  %v1654_v16 = vmul.f32 0.5, %v849_v11  ;;  %v852_v17 = vadd.f32 %v1265_v14, %v1623_v34  ;;  %v843_v18 = vpop.f32.mrb[7].mxu1  ;;  %v1004_v6 = vpop.permute.xlu0 %1003 }
 0x1ea   : > { %v1033_v19 = vmul.f32 %v964_v20, %v921_v56  ;;  %v922_v21 = vmul.f32 %v906_v13, %v874_v25  ;;  %v1657_v22 = vmul.f32 0.5, %v841_v3  ;;  %v844_v23 = vadd.f32 %v1623_v34, %v843_v18 }
 0x1eb   : > { %v1031_v26 = vmul.f32 %v954_v39, %v919_v53  ;;  %v920_v29 = vmul.f32 %v904_v58, %v872_v49  ;;  %1356 = vtanh.f32 %v1654_v16  ;;  %v882_v31 = vmul.f32 0.5, %v852_v17 }
 0x1ec   : > { %1049 = vst [vmem:[%s1652_s28 + $0x10] sm:$0xff] %v1033_v19  ;;  %v1034_v32 = vmul.f32 %v969_v51, %v922_v21  ;;  %1358 = vtanh.f32 %v1657_v22  ;;  %v880_v33 = vmul.f32 0.5, %v844_v23 }
 0x1ed   : > { %v1349_v35 = vpop.eup %1348  ;;  %1047 = vst [vmem:[%s1652_s28] sm:$0xff] %v1031_v26  ;;  %v1032_v36 = vmul.f32 %v959_v30, %v920_v29  ;;  %1360 = vtanh.f32 %v882_v31  ;;  %v1014_v13 = vpop.permute.xlu0 %1013 }
 0x1ee   : > { %v1351_v24 = vpop.eup %1350  ;;  %1050 = vst [vmem:[%s1652_s28 + $0x18] sm:$0xff] %v1034_v32  ;;  %v909_v37 = vadd.f32 1.0, %v1349_v35  ;;  %1362 = vtanh.f32 %v880_v33  ;;  %v1268_v38 = vpop.f32.mrb[8].mxu1 }
 0x1ef   : > { %v1353_v39 = vpop.eup %1352  ;;  %1048 = vst [vmem:[%s1652_s28 + $0x8] sm:$0xff] %v1032_v36  ;;  %v907_v41 = vadd.f32 1.0, %v1351_v24  ;;  %v865_v42 = vadd.f32 %v1268_v38, %v1623_v34  ;;  %v856_v43 = vpop.f32.mrb[9].mxu1 }
 0x1f0   : > { %v1355_v20 = vpop.eup %1354  ;;  %v925_v44 = vmul.f32 %v909_v37, %v877_v59  ;;  %v910_v28 = vadd.f32 1.0, %v1353_v39  ;;  %v857_v45 = vadd.f32 %v1623_v34, %v856_v43  ;;  %v1269_v46 = vpop.f32.mrb[10].mxu1 }
 0x1f1   : > { %v923_v25 = vmul.f32 %v907_v41, %v1632_v62  ;;  %v908_v49 = vadd.f32 1.0, %v1355_v20  ;;  %v885_v30 = vmul.f32 0.5, %v865_v42  ;;  %v868_v50 = vadd.f32 %v1269_v46, %v1623_v34  ;;  %v859_v51 = vpop.f32.mrb[11].mxu1 }
 0x1f2   : > { %v1037_v52 = vmul.f32 %v984_v15, %v925_v44  ;;  %v926_v54 = vmul.f32 %v910_v28, %v1637_v1  ;;  %v883_v55 = vmul.f32 0.5, %v857_v45  ;;  %v860_v57 = vadd.f32 %v1623_v34, %v859_v51 }
 0x1f3   : > { %v1035_v59 = vmul.f32 %v1635_v0, %v923_v25  ;;  %v924_v60 = vmul.f32 %v908_v49, %v1640_v2  ;;  %1364 = vtanh.f32 %v885_v30  ;;  %v886_v61 = vmul.f32 0.5, %v868_v50  ;;  %v1009_v2 = vpop.permute.xlu1 %1008 }
 0x1f4   : > { %1053 = vst [vmem:[%s1652_s28 + $0x30] sm:$0xff] %v1037_v52  ;;  %v1038_v62 = vmul.f32 %v989_v27, %v926_v54  ;;  %1366 = vtanh.f32 %v883_v55  ;;  %v884_v63 = vmul.f32 0.5, %v860_v57  ;;  %v1024_v27 = vpop.permute.xlu0 %1023 }
 0x1f5   : > { %v1357_v4 = vpop.eup %1356  ;;  %1051 = vst [vmem:[%s1652_s28 + $0x20] sm:$0xff] %v1035_v59  ;;  %v1036_v1 = vmul.f32 %v1642_v5, %v924_v60  ;;  %1368 = vtanh.f32 %v886_v61 }
 0x1f6   : > { %v1359_v7 = vpop.eup %1358  ;;  %1054 = vst [vmem:[%s1652_s28 + $0x38] sm:$0xff] %v1038_v62  ;;  %v913_v34 = vadd.f32 1.0, %v1357_v4  ;;  %1370 = vtanh.f32 %v884_v63 }
 0x1f7   : > { %v1361_v0 = vpop.eup %1360  ;;  %1052 = vst [vmem:[%s1652_s28 + $0x28] sm:$0xff] %v1036_v1  ;;  %v911_v8 = vadd.f32 1.0, %v1359_v7  ;;  %v1019_v58 = vpop.permute.xlu1 %1018 }
 0x1f8   : > { %v1363_v9 = vpop.eup %1362  ;;  %v929_v10 = vmul.f32 %v913_v34, %v1654_v16  ;;  %v914_v11 = vadd.f32 1.0, %v1361_v0 }
 0x1f9   : > { %v927_v12 = vmul.f32 %v911_v8, %v1657_v22  ;;  %v912_v48 = vadd.f32 1.0, %v1363_v9 }
 0x1fa   : > { %v1041_v5 = vmul.f32 %v1004_v6, %v929_v10  ;;  %v930_v56 = vmul.f32 %v914_v11, %v882_v31 }
 0x1fb   : > { %v1039_v3 = vmul.f32 %v994_v40, %v927_v12  ;;  %v928_v14 = vmul.f32 %v912_v48, %v880_v33  ;;  %v1029_v35 = vpop.permute.xlu1 %1028 }
 0x1fc   : > { %1057 = vst [vmem:[%s1652_s28 + $0x50] sm:$0xff] %v1041_v5  ;;  %v1042_v53 = vmul.f32 %v1009_v2, %v930_v56 }
 0x1fd   : > { %v1365_v15 = vpop.eup %1364  ;;  %1055 = vst [vmem:[%s1652_s28 + $0x40] sm:$0xff] %v1039_v3  ;;  %v1040_v17 = vmul.f32 %v999_v47, %v928_v14 }
 0x1fe   : > { %v1367_v18 = vpop.eup %1366  ;;  %1058 = vst [vmem:[%s1652_s28 + $0x58] sm:$0xff] %v1042_v53  ;;  %v917_v16 = vadd.f32 1.0, %v1365_v15 }
 0x1ff   : > { %v1369_v19 = vpop.eup %1368  ;;  %1056 = vst [vmem:[%s1652_s28 + $0x48] sm:$0xff] %v1040_v17  ;;  %v915_v21 = vadd.f32 1.0, %v1367_v18 }
 0x200   : > { %v1371_v22 = vpop.eup %1370  ;;  %v933_v23 = vmul.f32 %v917_v16, %v885_v30  ;;  %v918_v26 = vadd.f32 1.0, %v1369_v19 }
 0x201   : > { %v931_v29 = vmul.f32 %v915_v21, %v883_v55  ;;  %v916_v31 = vadd.f32 1.0, %v1371_v22 }
 0x202   : > { %v1045_v32 = vmul.f32 %v1024_v27, %v933_v23  ;;  %v934_v33 = vmul.f32 %v918_v26, %v886_v61 }
 0x203   : > { %v1043_v36 = vmul.f32 %v1014_v13, %v931_v29  ;;  %v932_v24 = vmul.f32 %v916_v31, %v884_v63 }
 0x204   : > { %1061 = vst [vmem:[%s1652_s28 + $0x70] sm:$0xff] %v1045_v32  ;;  %v1046_v37 = vmul.f32 %v1029_v35, %v934_v33 }
 0x205   : > { %1059 = vst [vmem:[%s1652_s28 + $0x60] sm:$0xff] %v1043_v36  ;;  %v1044_v38 = vmul.f32 %v1019_v58, %v932_v24 }
 0x206   : > { %1062 = vst [vmem:[%s1652_s28 + $0x78] sm:$0xff] %v1046_v37 }
 0x207   : > { %1060 = vst [vmem:[%s1652_s28 + $0x68] sm:$0xff] %v1044_v38 }
 0x208 PF: > { %s18_s27 = sadd.s32 1, %s1378_s27  }
 0x209   : > { %p15_p4 = scmp.ge.s32.totalorder %s18_s27, 4  }
 0x20b   :  { %17 = sbr.rel (!%p15_p4) target bundleno = 1 (0x1), region = 91 }

// kernel: mp_pde_forward.23
= control target key start
LH: loop header
LB: loop body
LE: loop exit
PB: predicated region body
PF: predicated region fallthrough
CT: control target
= control target key end

     0   :  { %s1157_s30 = smov 0   ;;  %s1295_s0 = inlined_call_operand.vmem [shape: f32[64,128], index: 0, kind: input, shape index: {}, may-alias: {0,9}]   ;;  %s1296_s1 = inlined_call_operand.vmem [shape: f32[64,128], index: 1, kind: input, shape index: {}]   ;;  %s1297_s2 = inlined_call_operand.vmem [shape: f32[64,1], index: 2, kind: input, shape index: {}]   ;;  %s1298_s3 = inlined_call_operand.vmem [shape: bf16[128,128], index: 3, kind: input, shape index: {}]   ;;  %s1299_s4 = inlined_call_operand.vmem [shape: bf16[128,128], index: 4, kind: input, shape index: {}]   ;;  %s1300_s5 = inlined_call_operand.vmem [shape: f32[1,128], index: 5, kind: input, shape index: {}]   ;;  %s1301_s6 = inlined_call_operand.vmem [shape: f32[1,128], index: 6, kind: input, shape index: {}]   ;;  %s1302_s7 = inlined_call_operand.vmem [shape: bf16[128,128], index: 7, kind: input, shape index: {}]   ;;  %s1303_s8 = inlined_call_operand.vmem [shape: f32[1,128], index: 8, kind: input, shape index: {}]   ;;  %s1304_s9 = inlined_call_operand.vmem [shape: f32[64,128], index: 9, kind: output, shape index: {}, may-alias: {0,9}]  }
   0x1 LB: > { %s911_s10 = sadd.s32 4294967295, %s1104_s30   ;;  %p915_p0 = scmp.ge.s32.totalorder %s1104_s30, 1  ;;  %s1104_s30 = sphi %s1157_s30, %s19_s30  }
   0x2   : > { %p310_p1 = scmp.lt.s32.totalorder %s1104_s30, 3 }
   0x4   : > { %p311_p2 = pnand %p915_p0, %p310_p1 }
   0x5   : > { %v1058_v0 = vld [vmem:[%s1299_s4] sm:$0xff] (!%p311_p2)   ;;  %s916_s13 = sshll.u32 (!%p311_p2), %s911_s10, 2  ;;  %v1059_v1 = vld [vmem:[%s1299_s4 + $0x8] sm:$0xff] (!%p311_p2)   ;;  %v1106_v2 = vmov (!%p311_p2), 0   ;;  %v1060_v3 = vld [vmem:[%s1299_s4 + $0x10] sm:$0xff] (!%p311_p2)  }
   0x6   : > { %314 = sbr.rel (%p311_p2) target bundleno = 546 (0x222), region = 56  ;;  %p357_p3 = scmp.lt.s32.totalorder (!%p311_p2), %s916_s13, 7  ;;  %983 = vmatprep.subr.bf16.mxu0 (!%p311_p2), %v1058_v0  ;;  %1056 = vset.pattern.permute.xlu0 (!%p311_p2), %v1106_v2  ;;  %v1061_v4 = vld [vmem:[%s1299_s4 + $0x18] sm:$0xff] (!%p311_p2)   ;;  %v1062_v8 = vld [vmem:[%s1299_s4 + $0x20] sm:$0xff] (!%p311_p2)   ;;  %v1063_v9 = vld [vmem:[%s1299_s4 + $0x28] sm:$0xff] (!%p311_p2)  }
   0x7   : > { %984 = vmatpush3.bf16.msra.mxu0 (!%p311_p2), %v1058_v0  ;;  %1057 = vset.pattern.permute.xlu1 (!%p311_p2), %v1106_v2  ;;  %v1064_v11 = vld [vmem:[%s1299_s4 + $0x30] sm:$0xff] (!%p311_p2)   ;;  %v1074_v15 = vld [vmem:[%s1302_s7] sm:$0xff] (!%p311_p2)   ;;  %v1065_v16 = vld [vmem:[%s1299_s4 + $0x38] sm:$0xff] (!%p311_p2)  }
   0x8   : > { %985 = vmatprep.subr.bf16.mxu0 (!%p311_p2), %v1059_v1  ;;  %1023 = vmatprep.subr.bf16.mxu1 (!%p311_p2), %v1074_v15  ;;  %v1066_v19 = vld [vmem:[%s1298_s3] sm:$0xff] (!%p311_p2)   ;;  %v1067_v24 = vld [vmem:[%s1298_s3 + $0x8] sm:$0xff] (!%p311_p2)   ;;  %v1068_v25 = vld [vmem:[%s1298_s3 + $0x10] sm:$0xff] (!%p311_p2)  }
   0x9   : > { %1024 = vmatpush3.bf16.msra.mxu1 (!%p311_p2), %v1074_v15  ;;  %v1069_v26 = vld [vmem:[%s1298_s3 + $0x18] sm:$0xff] (!%p311_p2)   ;;  %v1070_v27 = vld [vmem:[%s1298_s3 + $0x20] sm:$0xff] (!%p311_p2)   ;;  %v1071_v28 = vld [vmem:[%s1298_s3 + $0x28] sm:$0xff] (!%p311_p2)  }
   0xa   : > { %v1072_v29 = vld [vmem:[%s1298_s3 + $0x30] sm:$0xff] (!%p311_p2)   ;;  %v1073_v30 = vld [vmem:[%s1298_s3 + $0x38] sm:$0xff] (!%p311_p2)   ;;  %v1075_v34 = vld [vmem:[%s1302_s7 + $0x8] sm:$0xff] (!%p311_p2)  }
   0xb   : > { %986 = vmatpush3.bf16.msra.mxu0 (!%p311_p2), %v1059_v1  ;;  %1025 = vmatprep.subr.bf16.mxu1 (!%p311_p2), %v1075_v34  ;;  %v1076_v35 = vld [vmem:[%s1302_s7 + $0x10] sm:$0xff] (!%p311_p2)   ;;  %v1077_v36 = vld [vmem:[%s1302_s7 + $0x18] sm:$0xff] (!%p311_p2)   ;;  %v1078_v37 = vld [vmem:[%s1302_s7 + $0x20] sm:$0xff] (!%p311_p2)  }
   0xc   : > { %987 = vmatprep.subr.bf16.mxu0 (!%p311_p2), %v1060_v3  ;;  %v1079_v38 = vld [vmem:[%s1302_s7 + $0x28] sm:$0xff] (!%p311_p2)   ;;  %v1080_v39 = vld [vmem:[%s1302_s7 + $0x30] sm:$0xff] (!%p311_p2)   ;;  %v1081_v40 = vld [vmem:[%s1302_s7 + $0x38] sm:$0xff] (!%p311_p2)  }
   0xd   : > { %s1306_s13 = smov (!%p357_p3, %s916_s13), 7  ;;  %1026 = vmatpush3.bf16.msra.mxu1 %v1075_v34  ;;  %v924_v43 = vld [vmem:[%s1300_s5] ss:$0 sm:$0xff] }
   0xe   : > { %s1174_s18 = sshll.u32 %s1306_s13, 3  ;;  %1027 = vmatprep.subr.bf16.mxu1 %v1076_v35  ;;  %v941_v49 = vld [vmem:[%s1301_s6] ss:$0 sm:$0xff] }
   0xf   : > { %s1180_s21 = scalar_lea.vmem %s1296_s1, %s1174_s18  ;;  %988 = vmatpush3.bf16.msra.mxu0 %v1060_v3  ;;  %s372_s28 = scalar_lea.vmem %s1297_s2, %s1174_s18 }
  0x10   : > { %v438_v5 = vld [vmem:[%s1180_s21] sm:$0xff]  ;;  %v439_v6 = vld [vmem:[%s1180_s21 + $0x8] sm:$0xff]  ;;  %989 = vmatprep.subr.bf16.mxu0 %v1061_v4  ;;  %v383_v12 = vld [vmem:[%s372_s28 + $0x10] sm:$0xff]  ;;  %s1210_s20 = scalar_lea.vmem %s1295_s0, %s1174_s18  ;;  %s378_s23 = scalar_lea.vmem %s1304_s9, %s1174_s18 }
  0x11   : > { %v442_v7 = vpack.c.bf16 %v439_v6, %v438_v5  ;;  %v381_v10 = vld [vmem:[%s372_s28] sm:$0xff]  ;;  %v382_v13 = vld [vmem:[%s372_s28 + $0x8] sm:$0xff]  ;;  %398 = vperm.xlu1 %1057, %v383_v12   ;;  %v384_v14 = vld [vmem:[%s372_s28 + $0x18] sm:$0xff]  ;;  %1028 = vmatpush3.bf16.msra.mxu1 %v1076_v35 }
  0x12   : > { %388 = vperm.xlu0 %1056, %v381_v10   ;;  %v440_v17 = vld [vmem:[%s1180_s21 + $0x10] sm:$0xff]  ;;  %v441_v18 = vld [vmem:[%s1180_s21 + $0x18] sm:$0xff]  ;;  %v1218_v20 = vld [vmem:[%s1210_s20] sm:$0xff]  ;;  %1029 = vmatprep.subr.bf16.mxu1 %v1077_v36 }
  0x13   : > { %999 = vmatprep.mubr.bf16.mxu0 %v442_v7  ;;  %990 = vmatpush3.bf16.msra.mxu0 %v1061_v4  ;;  %v1221_v21 = vld [vmem:[%s1210_s20 + $0x8] sm:$0xff]  ;;  %v443_v22 = vpack.c.bf16 %v441_v18, %v440_v17  ;;  %v1247_v31 = vld [vmem:[%s1210_s20 + $0x18] sm:$0xff]  ;;  %v1250_v32 = vld [vmem:[%s1210_s20 + $0x10] sm:$0xff] }
  0x14   : > { %991 = vmatprep.subr.bf16.mxu0 %v1062_v8  ;;  %v420_v23 = vpack.c.bf16 %v1221_v21, %v1218_v20  ;;  %v421_v33 = vpack.c.bf16 %v1247_v31, %v1250_v32  ;;  %v942_v17 = vld [vmem:[%s1303_s8] ss:$0 sm:$0xff] }
  0x15   : > { %403 = vperm.xlu1 %1057, %v384_v14   ;;  %1030 = vmatpush3.bf16.msra.mxu1 %v1077_v36 }
  0x16   : > { %393 = vperm.xlu0 %1056, %v382_v13   ;;  %1031 = vmatprep.subr.bf16.mxu1 %v1078_v37 }
  0x17   : > { %992 = vmatpush3.bf16.msra.mxu0 %v1062_v8 }
  0x18   : > { %993 = vmatprep.subr.bf16.mxu0 %v1063_v9 }
  0x19   : > { %1032 = vmatpush3.bf16.msra.mxu1 %v1078_v37 }
  0x1a   : > { %1033 = vmatprep.subr.bf16.mxu1 %v1079_v38 }
  0x1b   : > { %994 = vmatpush3.bf16.msra.mxu0 %v1063_v9 }
  0x1c   : > { %995 = vmatprep.subr.bf16.mxu0 %v1064_v11 }
  0x1d   : > { %1034 = vmatpush3.bf16.msra.mxu1 %v1079_v38 }
  0x1e   : > { %1035 = vmatprep.subr.bf16.mxu1 %v1080_v39 }
  0x1f   : > { %996 = vmatpush3.bf16.msra.mxu0 %v1064_v11 }
  0x20   : > { %997 = vmatprep.subr.bf16.mxu0 %v1065_v16 }
  0x21   : > { %1036 = vmatpush3.bf16.msra.mxu1 %v1080_v39 }
  0x22   : > { %1037 = vmatprep.subr.bf16.mxu1 %v1081_v40 }
  0x23   : > { %998 = vmatpush3.bf16.msra.mxu0 %v1065_v16 }
  0x24   : > { %1003 = vmatprep.subr.bf16.mxu0 %v1066_v19 }
  0x25   : > { %1038 = vmatpush3.bf16.msra.mxu1 %v1081_v40 }
  0x26   : > { %1000 = vmatmul.mubr.bf16.vlgmr.msra.gmra.mrb[0].mxu0 %v443_v22 }
  0x27   : > { %1004 = vmatpush3.bf16.msra.mxu0 %v1066_v19  ;;  %1019 = vmatprep.mubr.bf16.mxu0 %v420_v23 }
  0x28   : > { %1005 = vmatprep.subr.bf16.mxu0 %v1067_v24 }
  0x2b   : > { %1006 = vmatpush3.bf16.msra.mxu0 %v1067_v24 }
  0x2c   : > { %1007 = vmatprep.subr.bf16.mxu0 %v1068_v25 }
  0x2f   : > { %1008 = vmatpush3.bf16.msra.mxu0 %v1068_v25 }
  0x30   : > { %1009 = vmatprep.subr.bf16.mxu0 %v1069_v26 }
  0x33   : > { %1010 = vmatpush3.bf16.msra.mxu0 %v1069_v26 }
  0x34   : > { %1011 = vmatprep.subr.bf16.mxu0 %v1070_v27 }
  0x37   : > { %1012 = vmatpush3.bf16.msra.mxu0 %v1070_v27 }
  0x38   : > { %1013 = vmatprep.subr.bf16.mxu0 %v1071_v28 }
  0x3b   : > { %1014 = vmatpush3.bf16.msra.mxu0 %v1071_v28 }
  0x3c   : > { %1015 = vmatprep.subr.bf16.mxu0 %v1072_v29 }
  0x3f   : > { %1016 = vmatpush3.bf16.msra.mxu0 %v1072_v29 }
  0x40   : > { %1017 = vmatprep.subr.bf16.mxu0 %v1073_v30 }
  0x43   : > { %1018 = vmatpush3.bf16.msra.mxu0 %v1073_v30 }
  0x46   : > { %1020 = vmatmul.mubr.bf16.vlgmr.msra.gmra.mrb[0].mxu0 %v421_v33 }
  0x90   : > { %v399_v41 = vpop.permute.xlu1 %398 }
  0x91   : > { %v389_v42 = vpop.permute.xlu0 %388  ;;  %v414_v44 = vmul.f32 %v924_v43, %v399_v41 }
  0x92   : > { %v412_v47 = vmul.f32 %v924_v43, %v389_v42 }
  0x94   : > { %v404_v45 = vpop.permute.xlu1 %403 }
  0x95   : > { %v394_v46 = vpop.permute.xlu0 %393  ;;  %v415_v50 = vmul.f32 %v924_v43, %v404_v45 }
  0x96   : > { %v413_v53 = vmul.f32 %v924_v43, %v394_v46 }
 0x119   : > { %v1021_v48 = vpop.f32.mrb[0].mxu0 }
 0x11a   : > { %v656_v51 = vadd.f32 %v1021_v48, %v414_v44  ;;  %v639_v52 = vpop.f32.mrb[1].mxu0 }
 0x11b   : > { %v654_v54 = vadd.f32 %v639_v52, %v412_v47  ;;  %v1022_v55 = vpop.f32.mrb[2].mxu0 }
 0x11c   : > { %v667_v56 = vadd.f32 %v941_v49, %v656_v51  ;;  %v657_v57 = vadd.f32 %v1022_v55, %v415_v50  ;;  %v642_v58 = vpop.f32.mrb[3].mxu0 }
 0x11d   : > { %v665_v59 = vadd.f32 %v941_v49, %v654_v54  ;;  %v655_v60 = vadd.f32 %v642_v58, %v413_v53 }
 0x11e   : > { %v671_v61 = vmul.f32 0.5, %v667_v56  ;;  %v668_v62 = vadd.f32 %v941_v49, %v657_v57 }
 0x11f   : > { %v669_v63 = vmul.f32 0.5, %v665_v59  ;;  %v666_v0 = vadd.f32 %v941_v49, %v655_v60 }
 0x120   : > { %1082 = vtanh.f32 %v671_v61  ;;  %v672_v1 = vmul.f32 0.5, %v668_v62 }
 0x121   : > { %1084 = vtanh.f32 %v669_v63  ;;  %v670_v2 = vmul.f32 0.5, %v666_v0 }
 0x122   : > { %1086 = vtanh.f32 %v672_v1 }
 0x123   : > { %1088 = vtanh.f32 %v670_v2 }
 0x12a   : > { %v1083_v3 = vpop.eup %1082 }
 0x12b   : > { %v1085_v4 = vpop.eup %1084  ;;  %v679_v5 = vadd.f32 1.0, %v1083_v3 }
 0x12c   : > { %v1087_v6 = vpop.eup %1086  ;;  %v677_v7 = vadd.f32 1.0, %v1085_v4 }
 0x12d   : > { %v1089_v8 = vpop.eup %1088  ;;  %v680_v9 = vadd.f32 1.0, %v1087_v6  ;;  %v683_v11 = vmul.f32 %v679_v5, %v671_v61 }
 0x12e   : > { %v678_v10 = vadd.f32 1.0, %v1089_v8  ;;  %v681_v13 = vmul.f32 %v677_v7, %v669_v63 }
 0x12f   : > { %v684_v12 = vmul.f32 %v680_v9, %v672_v1 }
 0x130   : > { %v682_v14 = vmul.f32 %v678_v10, %v670_v2 }
 0x131   : > { %v686_v15 = vpack.c.bf16 %v684_v12, %v683_v11 }
 0x132   : > { %v685_v16 = vpack.c.bf16 %v682_v14, %v681_v13 }
 0x134   : > { %1039 = vmatprep.mubr.bf16.mxu1 %v685_v16 }
 0x135   : > { %1040 = vmatmul.mubr.bf16.vlgmr.msra.gmra.mrb[0].mxu1 %v686_v15 }
 0x208   : > { %v1041_v18 = vpop.f32.mrb[0].mxu1 }
 0x209   : > { %v801_v19 = vadd.f32 %v1041_v18, %v942_v17  ;;  %v792_v22 = vpop.f32.mrb[1].mxu1 }
 0x20a   : > { %v793_v23 = vadd.f32 %v942_v17, %v792_v22  ;;  %v1042_v24 = vpop.f32.mrb[2].mxu1 }
 0x20b   : > { %v809_v25 = vmul.f32 0.5, %v801_v19  ;;  %v804_v26 = vadd.f32 %v1042_v24, %v942_v17  ;;  %v795_v27 = vpop.f32.mrb[3].mxu1 }
 0x20c   : > { %v807_v28 = vmul.f32 0.5, %v793_v23  ;;  %v796_v29 = vadd.f32 %v942_v17, %v795_v27 }
 0x20d   : > { %1090 = vtanh.f32 %v809_v25  ;;  %v810_v30 = vmul.f32 0.5, %v804_v26 }
 0x20e   : > { %1092 = vtanh.f32 %v807_v28  ;;  %v808_v33 = vmul.f32 0.5, %v796_v29 }
 0x20f   : > { %1094 = vtanh.f32 %v810_v30 }
 0x210   : > { %1096 = vtanh.f32 %v808_v33 }
 0x217   : > { %v1091_v34 = vpop.eup %1090 }
 0x218   : > { %v1093_v35 = vpop.eup %1092  ;;  %v817_v36 = vadd.f32 1.0, %v1091_v34 }
 0x219   : > { %v1095_v37 = vpop.eup %1094  ;;  %v815_v38 = vadd.f32 1.0, %v1093_v35 }
 0x21a   : > { %v1097_v39 = vpop.eup %1096  ;;  %v818_v40 = vadd.f32 1.0, %v1095_v37  ;;  %v821_v43 = vmul.f32 %v817_v36, %v809_v25 }
 0x21b   : > { %v819_v41 = vmul.f32 %v815_v38, %v807_v28  ;;  %v816_v42 = vadd.f32 1.0, %v1097_v39 }
 0x21c   : > { %v822_v45 = vmul.f32 %v818_v40, %v810_v30  ;;  %v825_v48 = vadd.f32 %v821_v43, %v1250_v32 }
 0x21d   : > { %v823_v44 = vadd.f32 %v819_v41, %v1218_v20  ;;  %v820_v46 = vmul.f32 %v816_v42, %v808_v33 }
 0x21e   : > { %v826_v49 = vadd.f32 %v822_v45, %v1247_v31  ;;  %829 = vst [vmem:[%s378_s23 + $0x10] sm:$0xff] %v825_v48 }
 0x21f   : > { %827 = vst [vmem:[%s378_s23] sm:$0xff] %v823_v44  ;;  %v824_v47 = vadd.f32 %v820_v46, %v1221_v21 }
 0x220   : > { %830 = vst [vmem:[%s378_s23 + $0x18] sm:$0xff] %v826_v49 }
 0x221   : > { %828 = vst [vmem:[%s378_s23 + $0x8] sm:$0xff] %v824_v47 }
 0x222 PF: > { %s19_s30 = sadd.s32 1, %s1104_s30  }
 0x223   : > { %p16_p4 = scmp.ge.s32.totalorder %s19_s30, 4  }
 0x225   :  { %18 = sbr.rel (!%p16_p4) target bundleno = 1 (0x1), region = 92 }

// kernel: mp_pde_forward.39
= control target key start
LH: loop header
LB: loop body
LE: loop exit
PB: predicated region body
PF: predicated region fallthrough
CT: control target
= control target key end

     0   :  { %s1343_s24 = smov 0   ;;  %s1525_s0 = inlined_call_operand.vmem [shape: f32[64,128], index: 0, kind: input, shape index: {}]   ;;  %s1526_s1 = inlined_call_operand.vmem [shape: f32[64,1], index: 1, kind: input, shape index: {}]   ;;  %s1527_s2 = inlined_call_operand.vmem [shape: bf16[128,384], index: 2, kind: input, shape index: {}]   ;;  %s1528_s3 = inlined_call_operand.vmem [shape: f32[1,384], index: 3, kind: input, shape index: {}]   ;;  %s1529_s4 = inlined_call_operand.vmem [shape: bf16[384,128], index: 4, kind: input, shape index: {}]   ;;  %s1530_s5 = inlined_call_operand.vmem [shape: f32[1,128], index: 5, kind: input, shape index: {}]   ;;  %s1531_s6 = inlined_call_operand.vmem [shape: f32[1,128], index: 6, kind: input, shape index: {}]   ;;  %s1532_s7 = inlined_call_operand.vmem [shape: f32[64,128], index: 7, kind: output, shape index: {}]  }
   0x1 LB: > { %s1052_s25 = sadd.s32 4294967295, %s1300_s24   ;;  %p1056_p0 = scmp.ge.s32.totalorder %s1300_s24, 1  ;;  %s1300_s24 = sphi %s1343_s24, %s17_s24  }
   0x2   : > { %p249_p1 = scmp.lt.s32.totalorder %s1300_s24, 3 }
   0x4   : > { %p250_p2 = pnand %p1056_p0, %p249_p1 }
   0x5   : > { %v1214_v0 = vld [vmem:[%s1527_s2 + $0x4] ss:$12 sps:$4 sm:$0xff] (!%p250_p2)   ;;  %s1057_s28 = sshll.u32 (!%p250_p2), %s1052_s25, 2  ;;  %v1216_v1 = vld [vmem:[%s1527_s2 + $0x8] ss:$12 sps:$4 sm:$0xff] (!%p250_p2)   ;;  %v1302_v2 = vmov (!%p250_p2), 0   ;;  %v345_v59 = vlaneseq (!%p250_p2) }
   0x6   : > { %253 = sbr.rel (%p250_p2) target bundleno = 513 (0x201), region = 48  ;;  %520 = vmatprep.mubr.bf16.mxu0 (!%p250_p2), %v1302_v2  ;;  %1212 = vset.pattern.permute.xlu0 (!%p250_p2), %v1302_v2  ;;  %v1217_v3 = vld [vmem:[%s1527_s2] ss:$12 sps:$4 sm:$0xff] (!%p250_p2)   ;;  %p287_p3 = scmp.lt.s32.totalorder (!%p250_p2), %s1057_s28, 7  ;;  %v1218_v4 = vld [vmem:[%s1527_s2 + $0x1c] ss:$12 sps:$4 sm:$0xff] (!%p250_p2)  }
   0x7   : > { %488 = vmatprep.subr.bf16.mxu0 (!%p250_p2), %v1214_v0  ;;  %1213 = vset.pattern.permute.xlu1 (!%p250_p2), %v1302_v2  ;;  %v1220_v5 = vld [vmem:[%s1527_s2 + $0x20] ss:$12 sps:$4 sm:$0xff] (!%p250_p2)   ;;  %v1221_v6 = vld [vmem:[%s1527_s2 + $0x18] ss:$12 sps:$4 sm:$0xff] (!%p250_p2)   ;;  %v1225_v9 = vld [vmem:[%s1527_s2 + $0x30] ss:$12 sps:$4 sm:$0xff] (!%p250_p2)  }
   0x8   : > { %1163 = vmatprep.subr.bf16.mxu1 (!%p250_p2), %v1216_v1  ;;  %489 = vmatpush1.bf16.msra.mxu0 (!%p250_p2), %v1217_v3  ;;  %v1222_v7 = vld [vmem:[%s1527_s2 + $0x34] ss:$12 sps:$4 sm:$0xff] (!%p250_p2)   ;;  %v1224_v8 = vld [vmem:[%s1527_s2 + $0x38] ss:$12 sps:$4 sm:$0xff] (!%p250_p2)   ;;  %v1228_v11 = vld [vmem:[%s1527_s2 + $0x50] ss:$12 sps:$4 sm:$0xff] (!%p250_p2)  }
   0x9   : > { %1164 = vmatpush3.bf16.msra.mxu1 (!%p250_p2), %v1216_v1  ;;  %490 = vmatprep.subr.bf16.mxu0 (!%p250_p2), %v1218_v4  ;;  %v1226_v10 = vld [vmem:[%s1527_s2 + $0x4c] ss:$12 sps:$4 sm:$0xff] (!%p250_p2)   ;;  %v1229_v12 = vld [vmem:[%s1527_s2 + $0x48] ss:$12 sps:$4 sm:$0xff] (!%p250_p2)   ;;  %v1230_v13 = vld [vmem:[%s1527_s2 + $0x64] ss:$12 sps:$4 sm:$0xff] (!%p250_p2)  }
   0xa   : > { %1165 = vmatprep.subr.bf16.mxu1 (!%p250_p2), %v1220_v5  ;;  %v1232_v14 = vld [vmem:[%s1527_s2 + $0x68] ss:$12 sps:$4 sm:$0xff] (!%p250_p2)   ;;  %v1233_v15 = vld [vmem:[%s1527_s2 + $0x60] ss:$12 sps:$4 sm:$0xff] (!%p250_p2)   ;;  %v1237_v19 = vld [vmem:[%s1527_s2 + $0x78] ss:$12 sps:$4 sm:$0xff] (!%p250_p2)  }
   0xb   : > { %v1234_v16 = vld [vmem:[%s1527_s2 + $0x7c] ss:$12 sps:$4 sm:$0xff] (!%p250_p2)   ;;  %v1236_v17 = vld [vmem:[%s1527_s2 + $0x80] ss:$12 sps:$4 sm:$0xff] (!%p250_p2)   ;;  %v1240_v23 = vld [vmem:[%s1527_s2 + $0x98] ss:$12 sps:$4 sm:$0xff] (!%p250_p2)  }
   0xc   : > { %491 = vmatpush1.bf16.msra.mxu0 (!%p250_p2), %v1221_v6  ;;  %v1238_v21 = vld [vmem:[%s1527_s2 + $0x94] ss:$12 sps:$4 sm:$0xff] (!%p250_p2)   ;;  %v1241_v24 = vld [vmem:[%s1527_s2 + $0x90] ss:$12 sps:$4 sm:$0xff] (!%p250_p2)   ;;  %v1242_v25 = vld [vmem:[%s1527_s2 + $0xac] ss:$12 sps:$4 sm:$0xff] (!%p250_p2)  }
   0xd   : > { %s1534_s28 = smov (!%p287_p3, %s1057_s28), 7  ;;  %1166 = vmatpush3.bf16.msra.mxu1 %v1220_v5  ;;  %492 = vmatprep.subr.bf16.mxu0 %v1222_v7  ;;  %v1244_v26 = vld [vmem:[%s1527_s2 + $0xb0] ss:$12 sps:$4 sm:$0xff]   ;;  %v1245_v27 = vld [vmem:[%s1527_s2 + $0xa8] ss:$12 sps:$4 sm:$0xff]   ;;  %v1246_v30 = vld [vmem:[%s1529_s4 + $0x40] sm:$0xff]  }
   0xe   : > { %1167 = vmatprep.subr.bf16.mxu1 %v1224_v8  ;;  %s1390_s30 = sshll.u32 %s1534_s28, 3  ;;  %v1247_v31 = vld [vmem:[%s1529_s4 + $0x80] sm:$0xff]   ;;  %v1249_v34 = vld [vmem:[%s1529_s4 + $0x48] sm:$0xff]   ;;  %v1252_v37 = vld [vmem:[%s1529_s4 + $0x50] sm:$0xff]   ;;  %v346_v60 = vshrl.u32 %v345_v59, 7 }
   0xf   : > { %s290_s28 = scalar_lea.vmem %s1525_s0, %s1390_s30  ;;  %v1248_v32 = vld [vmem:[%s1529_s4] sm:$0xff]   ;;  %v1250_v35 = vld [vmem:[%s1529_s4 + $0x88] sm:$0xff]   ;;  %v1253_v38 = vld [vmem:[%s1529_s4 + $0x90] sm:$0xff]   ;;  %s302_s10 = scalar_lea.vmem %s1532_s7, %s1390_s30 }
  0x10   : > { %493 = vmatpush1.bf16.msra.mxu0 %v1225_v9  ;;  %v305_v18 = vld [vmem:[%s290_s28] sm:$0xff]  ;;  %v306_v20 = vld [vmem:[%s290_s28 + $0x8] sm:$0xff]  ;;  %v307_v28 = vld [vmem:[%s290_s28 + $0x10] sm:$0xff]  ;;  %v347_v61 = vsub.s32 0, %v346_v60  ;;  %v355_v62 = vsub.s32 2, %v346_v60  ;;  %v351_v0 = vsub.s32 1, %v346_v60 }
  0x11   : > { %1168 = vmatpush3.bf16.msra.mxu1 %v1224_v8  ;;  %494 = vmatprep.subr.bf16.mxu0 %v1226_v10  ;;  %v309_v22 = vpack.c.bf16 %v306_v20, %v305_v18  ;;  %v308_v29 = vld [vmem:[%s290_s28 + $0x18] sm:$0xff]  ;;  %v1251_v36 = vld [vmem:[%s1529_s4 + $0x8] sm:$0xff]   ;;  %v1254_v39 = vld [vmem:[%s1529_s4 + $0x10] sm:$0xff]   ;;  %s296_s28 = scalar_lea.vmem %s1526_s1, %s1390_s30 }
  0x12   : > { %1169 = vmatprep.subr.bf16.mxu1 %v1228_v11  ;;  %v310_v33 = vpack.c.bf16 %v308_v29, %v307_v28  ;;  %v1255_v40 = vld [vmem:[%s1529_s4 + $0x58] sm:$0xff]   ;;  %v1258_v43 = vld [vmem:[%s1529_s4 + $0x60] sm:$0xff]   ;;  %v1261_v46 = vld [vmem:[%s1529_s4 + $0x68] sm:$0xff]  }
  0x13   : > { %1179 = vmatprep.mubr.bf16.mxu1 %v309_v22  ;;  %v1256_v41 = vld [vmem:[%s1529_s4 + $0x98] sm:$0xff]   ;;  %v1259_v44 = vld [vmem:[%s1529_s4 + $0xa0] sm:$0xff]   ;;  %v1262_v47 = vld [vmem:[%s1529_s4 + $0xa8] sm:$0xff]  }
  0x14   : > { %495 = vmatpush1.bf16.msra.mxu0 %v1229_v12  ;;  %v1257_v42 = vld [vmem:[%s1529_s4 + $0x18] sm:$0xff]   ;;  %v1260_v45 = vld [vmem:[%s1529_s4 + $0x20] sm:$0xff]   ;;  %v1263_v48 = vld [vmem:[%s1529_s4 + $0x28] sm:$0xff]  }
  0x15   : > { %1170 = vmatpush3.bf16.msra.mxu1 %v1228_v11  ;;  %496 = vmatprep.subr.bf16.mxu0 %v1230_v13  ;;  %v1264_v49 = vld [vmem:[%s1529_s4 + $0x70] sm:$0xff]   ;;  %v1267_v52 = vld [vmem:[%s1529_s4 + $0x78] sm:$0xff]   ;;  %v941_v55 = vld [vmem:[%s296_s28] sm:$0xff] }
  0x16   : > { %1171 = vmatprep.subr.bf16.mxu1 %v1232_v14  ;;  %v1265_v50 = vld [vmem:[%s1529_s4 + $0xb0] sm:$0xff]   ;;  %v1268_v53 = vld [vmem:[%s1529_s4 + $0xb8] sm:$0xff]   ;;  %958 = vperm.xlu0 %1212, %v941_v55   ;;  %v942_v57 = vld [vmem:[%s296_s28 + $0x8] sm:$0xff] }
  0x17   : > { %v1266_v51 = vld [vmem:[%s1529_s4 + $0x30] sm:$0xff]   ;;  %v1269_v54 = vld [vmem:[%s1529_s4 + $0x38] sm:$0xff]   ;;  %v343_v63 = vld [vmem:[%s1528_s3] sm:$0x7] }
  0x18   : > { %497 = vmatpush1.bf16.msra.mxu0 %v1233_v15  ;;  %v943_v56 = vld [vmem:[%s296_s28 + $0x10] sm:$0xff]  ;;  %v944_v58 = vld [vmem:[%s296_s28 + $0x18] sm:$0xff]  ;;  %v348_v1 = vrot.slane %v343_v63, %v347_v61  ;;  %v352_v3 = vrot.slane %v343_v63, %v351_v0 }
  0x19   : > { %1172 = vmatpush3.bf16.msra.mxu1 %v1232_v14  ;;  %498 = vmatprep.subr.bf16.mxu0 %v1234_v16 }
  0x1a   : > { %1173 = vmatprep.subr.bf16.mxu1 %v1236_v17  ;;  %968 = vperm.xlu1 %1213, %v943_v56  }
  0x1b   : > { %963 = vperm.xlu0 %1212, %v942_v57  }
  0x1c   : > { %499 = vmatpush1.bf16.msra.mxu0 %v1237_v19 }
  0x1d   : > { %1174 = vmatpush3.bf16.msra.mxu1 %v1236_v17  ;;  %500 = vmatprep.subr.bf16.mxu0 %v1238_v21 }
  0x1e   : > { %1175 = vmatprep.subr.bf16.mxu1 %v1240_v23  ;;  %973 = vperm.xlu1 %1213, %v944_v58  }
  0x20   : > { %501 = vmatpush1.bf16.msra.mxu0 %v1241_v24 }
  0x21   : > { %1176 = vmatpush3.bf16.msra.mxu1 %v1240_v23  ;;  %502 = vmatprep.subr.bf16.mxu0 %v1242_v25 }
  0x22   : > { %1177 = vmatprep.subr.bf16.mxu1 %v1244_v26 }
  0x24   : > { %503 = vmatpush1.bf16.msra.mxu0 %v1245_v27 }
  0x25   : > { %1178 = vmatpush3.bf16.msra.mxu1 %v1244_v26  ;;  %1125 = vmatprep.subr.bf16.mxu0 %v1246_v30 }
  0x26   : > { %1183 = vmatprep.subr.bf16.mxu1 %v1247_v31 }
  0x27   : > { %521 = vmatmul.mubr.bf16.vlgmr.msra.gmra.mrb[0].mxu0 %v309_v22 }
  0x28   : > { %1180 = vmatmul.mubr.bf16.vlgmr.msra.gmra.mrb[0].mxu1 %v310_v33  ;;  %530 = vmatprep.mubr.bf16.mxu0 %v1302_v2  ;;  %v356_v2 = vrot.slane %v343_v63, %v355_v62 }
  0x29   : > { %1126 = vmatpush3.bf16.msra.mxu0 %v1248_v32  ;;  %1184 = vmatpush3.bf16.msra.mxu1 %v1247_v31 }
  0x2a   : > { %1127 = vmatprep.subr.bf16.mxu0 %v1249_v34  ;;  %1185 = vmatprep.subr.bf16.mxu1 %v1250_v35 }
  0x2d   : > { %1128 = vmatpush3.bf16.msra.mxu0 %v1251_v36  ;;  %1186 = vmatpush3.bf16.msra.mxu1 %v1250_v35 }
  0x2e   : > { %1129 = vmatprep.subr.bf16.mxu0 %v1252_v37  ;;  %1187 = vmatprep.subr.bf16.mxu1 %v1253_v38 }
  0x2f   : > { %531 = vmatmul.mubr.bf16.gmra.mrb[4].mxu0 %v310_v33 }
  0x31   : > { %1188 = vmatpush3.bf16.msra.mxu1 %v1253_v38  ;;  %1130 = vmatpush3.bf16.msra.mxu0 %v1254_v39 }
  0x32   : > { %1131 = vmatprep.subr.bf16.mxu0 %v1255_v40  ;;  %1189 = vmatprep.subr.bf16.mxu1 %v1256_v41 }
  0x35   : > { %1132 = vmatpush3.bf16.msra.mxu0 %v1257_v42  ;;  %1190 = vmatpush3.bf16.msra.mxu1 %v1256_v41 }
  0x36   : > { %1133 = vmatprep.subr.bf16.mxu0 %v1258_v43  ;;  %1191 = vmatprep.subr.bf16.mxu1 %v1259_v44 }
  0x39   : > { %1134 = vmatpush3.bf16.msra.mxu0 %v1260_v45  ;;  %1192 = vmatpush3.bf16.msra.mxu1 %v1259_v44 }
  0x3a   : > { %1135 = vmatprep.subr.bf16.mxu0 %v1261_v46  ;;  %1193 = vmatprep.subr.bf16.mxu1 %v1262_v47 }
  0x3d   : > { %1136 = vmatpush3.bf16.msra.mxu0 %v1263_v48  ;;  %1194 = vmatpush3.bf16.msra.mxu1 %v1262_v47 }
  0x3e   : > { %1137 = vmatprep.subr.bf16.mxu0 %v1264_v49  ;;  %1195 = vmatprep.subr.bf16.mxu1 %v1265_v50 }
  0x41   : > { %1138 = vmatpush3.bf16.msra.mxu0 %v1266_v51  ;;  %1196 = vmatpush3.bf16.msra.mxu1 %v1265_v50 }
  0x42   : > { %1139 = vmatprep.subr.bf16.mxu0 %v1267_v52  ;;  %1197 = vmatprep.subr.bf16.mxu1 %v1268_v53 }
  0x45   : > { %1140 = vmatpush3.bf16.msra.mxu0 %v1269_v54  ;;  %1198 = vmatpush3.bf16.msra.mxu1 %v1268_v53 }
  0xfa   : > { %v522_v4 = vpop.f32.mrb[0].mxu0 }
  0xfb   : > { %v1181_v5 = vpop.f32.mrb[0].mxu1  ;;  %v523_v6 = vadd.f32 %v522_v4, %v348_v1  ;;  %v524_v8 = vpop.f32.mrb[1].mxu0 }
  0xfc   : > { %v584_v7 = vadd.f32 %v1181_v5, %v356_v2  ;;  %v575_v9 = vpop.f32.mrb[1].mxu1  ;;  %v525_v10 = vadd.f32 %v524_v8, %v352_v3  ;;  %v526_v12 = vpop.f32.mrb[2].mxu0 }
  0xfd   : > { %v576_v11 = vadd.f32 %v575_v9, %v356_v2  ;;  %v1182_v13 = vpop.f32.mrb[2].mxu1  ;;  %v590_v14 = vmul.f32 0.5, %v523_v6  ;;  %v527_v16 = vadd.f32 %v526_v12, %v348_v1  ;;  %v528_v18 = vpop.f32.mrb[3].mxu0 }
  0xfe   : > { %v598_v15 = vmul.f32 0.5, %v584_v7  ;;  %v587_v17 = vadd.f32 %v1182_v13, %v356_v2  ;;  %v578_v19 = vpop.f32.mrb[3].mxu1  ;;  %v591_v20 = vmul.f32 0.5, %v525_v10  ;;  %v529_v22 = vadd.f32 %v528_v18, %v352_v3 }
  0xff   : > { %v592_v21 = vmul.f32 0.5, %v576_v11  ;;  %v579_v23 = vadd.f32 %v578_v19, %v356_v2  ;;  %1270 = vtanh.f32 %v590_v14  ;;  %v593_v24 = vmul.f32 0.5, %v527_v16  ;;  %v959_v19 = vpop.permute.xlu0 %958 }
 0x100   : > { %1272 = vtanh.f32 %v598_v15  ;;  %v601_v25 = vmul.f32 0.5, %v587_v17  ;;  %v594_v26 = vmul.f32 0.5, %v529_v22  ;;  %v1087_v22 = vld [vmem:[%s1530_s5] ss:$0 sm:$0xff] }
 0x101   : > { %1274 = vtanh.f32 %v591_v20  ;;  %v595_v27 = vmul.f32 0.5, %v579_v23 }
 0x102   : > { %1276 = vtanh.f32 %v592_v21  ;;  %v532_v28 = vpop.f32.mrb[4].mxu0 }
 0x103   : > { %1278 = vtanh.f32 %v593_v24  ;;  %v533_v29 = vadd.f32 %v532_v28, %v348_v1  ;;  %v534_v30 = vpop.f32.mrb[5].mxu0 }
 0x104   : > { %1280 = vtanh.f32 %v601_v25  ;;  %v535_v31 = vadd.f32 %v534_v30, %v352_v3  ;;  %v536_v32 = vpop.f32.mrb[6].mxu0 }
 0x105   : > { %1282 = vtanh.f32 %v594_v26  ;;  %v596_v33 = vmul.f32 0.5, %v533_v29  ;;  %v537_v34 = vadd.f32 %v536_v32, %v348_v1  ;;  %v538_v35 = vpop.f32.mrb[7].mxu0 }
 0x106   : > { %1284 = vtanh.f32 %v595_v27  ;;  %v597_v36 = vmul.f32 0.5, %v535_v31  ;;  %v539_v37 = vadd.f32 %v538_v35, %v352_v3  ;;  %v1112_v31 = vld [vmem:[%s1531_s6] ss:$0 sm:$0xff] }
 0x107   : > { %1286 = vtanh.f32 %v596_v33  ;;  %v599_v38 = vmul.f32 0.5, %v537_v34 }
 0x108   : > { %1288 = vtanh.f32 %v597_v36  ;;  %v600_v39 = vmul.f32 0.5, %v539_v37 }
 0x109   : > { %v1271_v40 = vpop.eup %1270  ;;  %1290 = vtanh.f32 %v599_v38 }
 0x10a   : > { %v1273_v41 = vpop.eup %1272  ;;  %1292 = vtanh.f32 %v600_v39  ;;  %v614_v44 = vadd.f32 1.0, %v1271_v40 }
 0x10b   : > { %v1275_v42 = vpop.eup %1274  ;;  %v622_v46 = vadd.f32 1.0, %v1273_v41 }
 0x10c   : > { %v1277_v43 = vpop.eup %1276  ;;  %v615_v48 = vadd.f32 1.0, %v1275_v42  ;;  %v626_v54 = vmul.f32 %v614_v44, %v590_v14 }
 0x10d   : > { %v1279_v45 = vpop.eup %1278  ;;  %v616_v51 = vadd.f32 1.0, %v1277_v43  ;;  %v634_v58 = vmul.f32 %v622_v46, %v598_v15 }
 0x10e   : > { %v1281_v47 = vpop.eup %1280  ;;  %v617_v49 = vadd.f32 1.0, %v1279_v45  ;;  %v627_v62 = vmul.f32 %v615_v48, %v591_v20 }
 0x10f   : > { %v1283_v50 = vpop.eup %1282  ;;  %v625_v52 = vadd.f32 1.0, %v1281_v47  ;;  %v628_v3 = vmul.f32 %v616_v51, %v592_v21  ;;  %v969_v47 = vpop.permute.xlu1 %968 }
 0x110   : > { %v1285_v53 = vpop.eup %1284  ;;  %v629_v55 = vmul.f32 %v617_v49, %v593_v24  ;;  %v618_v56 = vadd.f32 1.0, %v1283_v50 }
 0x111   : > { %v1287_v57 = vpop.eup %1286  ;;  %v637_v59 = vmul.f32 %v625_v52, %v601_v25  ;;  %v619_v60 = vadd.f32 1.0, %v1285_v53 }
 0x112   : > { %v1289_v61 = vpop.eup %1288  ;;  %v638_v63 = vpack.c.bf16 %v629_v55, %v626_v54  ;;  %v630_v0 = vmul.f32 %v618_v56, %v594_v26  ;;  %v620_v1 = vadd.f32 1.0, %v1287_v57 }
 0x113   : > { %v1291_v2 = vpop.eup %1290  ;;  %v643_v4 = vpack.c.bf16 %v637_v59, %v634_v58  ;;  %v631_v5 = vmul.f32 %v619_v60, %v595_v27  ;;  %v621_v6 = vadd.f32 1.0, %v1289_v61  ;;  %v974_v54 = vpop.permute.xlu1 %973 }
 0x114   : > { %v1293_v7 = vpop.eup %1292  ;;  %v623_v8 = vadd.f32 1.0, %v1291_v2  ;;  %v639_v9 = vpack.c.bf16 %v630_v0, %v627_v62  ;;  %v632_v12 = vmul.f32 %v620_v1, %v596_v33 }
 0x115   : > { %v624_v10 = vadd.f32 1.0, %v1293_v7  ;;  %v640_v11 = vpack.c.bf16 %v631_v5, %v628_v3  ;;  %v633_v14 = vmul.f32 %v621_v6, %v597_v36 }
 0x116   : > { %v635_v13 = vmul.f32 %v623_v8, %v599_v38  ;;  %875 = vmatprep.mubr.bf16.mxu0 %v639_v9  ;;  %v964_v38 = vpop.permute.xlu0 %963 }
 0x117   : > { %v636_v15 = vmul.f32 %v624_v10, %v600_v39  ;;  %1199 = vmatprep.mubr.bf16.mxu1 %v640_v11  ;;  %876 = vmatmul.mubr.bf16.vlgmr.msra.gmra.mrb[8].mxu0 %v638_v63 }
 0x118   : > { %1200 = vmatmul.mubr.bf16.vlgmr.msra.gmra.mrb[4].mxu1 %v643_v4  ;;  %v641_v16 = vpack.c.bf16 %v635_v13, %v632_v12 }
 0x119   : > { %v642_v17 = vpack.c.bf16 %v636_v15, %v633_v14 }
 0x11b   : > { %883 = vmatprep.mubr.bf16.mxu0 %v642_v17 }
 0x11f   : > { %884 = vmatmul.mubr.bf16.gmra.mrb[12].mxu0 %v641_v16 }
 0x1ea   : > { %v1141_v18 = vpop.f32.mrb[8].mxu0 }
 0x1eb   : > { %v1201_v20 = vpop.f32.mrb[4].mxu1  ;;  %v1142_v21 = vpop.f32.mrb[9].mxu0 }
 0x1ec   : > { %v1143_v23 = vadd.f32 %v1142_v21, %v1141_v18  ;;  %v926_v24 = vpop.f32.mrb[5].mxu1  ;;  %v1144_v25 = vpop.f32.mrb[10].mxu0 }
 0x1ed   : > { %v1202_v26 = vpop.f32.mrb[6].mxu1  ;;  %v1145_v27 = vpop.f32.mrb[11].mxu0 }
 0x1ee   : > { %v878_v28 = vadd.f32 %v1143_v23, %v1087_v22  ;;  %v1146_v29 = vadd.f32 %v1145_v27, %v1144_v25  ;;  %v929_v30 = vpop.f32.mrb[7].mxu1 }
 0x1f0   : > { %v927_v32 = vadd.f32 %v926_v24, %v878_v28  ;;  %v881_v33 = vadd.f32 %v1146_v29, %v1087_v22 }
 0x1f2   : > { %v930_v34 = vadd.f32 %v929_v30, %v881_v33  ;;  %v952_v35 = vmul.f32 %v1112_v31, %v927_v32  ;;  %v1147_v36 = vpop.f32.mrb[12].mxu0 }
 0x1f3   : > { %v1148_v37 = vpop.f32.mrb[13].mxu0 }
 0x1f4   : > { %v976_v39 = vadd.f32 %v959_v19, %v952_v35  ;;  %v1149_v40 = vadd.f32 %v1148_v37, %v1147_v36  ;;  %v1150_v41 = vpop.f32.mrb[14].mxu0  ;;  %v953_v42 = vmul.f32 %v1112_v31, %v930_v34 }
 0x1f5   : > { %v1151_v43 = vpop.f32.mrb[15].mxu0 }
 0x1f6   : > { %980 = vst [vmem:[%s302_s10] sm:$0xff] %v976_v39  ;;  %v886_v44 = vadd.f32 %v1149_v40, %v1087_v22  ;;  %v977_v45 = vadd.f32 %v964_v38, %v953_v42  ;;  %v1152_v46 = vadd.f32 %v1151_v43, %v1150_v41 }
 0x1f8   : > { %v935_v48 = vadd.f32 %v1201_v20, %v886_v44  ;;  %981 = vst [vmem:[%s302_s10 + $0x8] sm:$0xff] %v977_v45  ;;  %v889_v49 = vadd.f32 %v1152_v46, %v1087_v22 }
 0x1fa   : > { %v954_v50 = vmul.f32 %v1112_v31, %v935_v48  ;;  %v938_v51 = vadd.f32 %v1202_v26, %v889_v49 }
 0x1fc   : > { %v978_v52 = vadd.f32 %v969_v47, %v954_v50  ;;  %v955_v53 = vmul.f32 %v1112_v31, %v938_v51 }
 0x1fe   : > { %982 = vst [vmem:[%s302_s10 + $0x10] sm:$0xff] %v978_v52  ;;  %v979_v55 = vadd.f32 %v974_v54, %v955_v53 }
 0x200   : > { %983 = vst [vmem:[%s302_s10 + $0x18] sm:$0xff] %v979_v55 }
 0x201 PF: > { %s17_s24 = sadd.s32 1, %s1300_s24  }
 0x202   : > { %p14_p4 = scmp.ge.s32.totalorder %s17_s24, 4  }
 0x204   :  { %16 = sbr.rel (!%p14_p4) target bundleno = 1 (0x1), region = 81 }

</bundles_post_ra>
